<compile_context>
chip_gen: v5e
topology: v5e:2x2
jax: 0.10.0
libtpu: 0.0.40
codegen_flags: <defaults>
</compile_context>

<pallas_src>
import functools

import jax
import jax.numpy as jnp
from jax.experimental import pallas as pl
from jax.experimental.pallas import tpu as pltpu

_OUT_SCALE = 0.001


def _round_up(n, m):
    return ((n + m - 1) // m) * m


def _fused_tracker_kernel(z_ref, x_ref, w_ref, b_ref, o_ref, col_ref, *,
                          nb, Cin_pad, K, Wz, Wx, Hzf, Wzf,
                          Lz_slab, Lx_slab, Lr_pad):
    """nb batch samples per grid step.

    z_ref  : (nb, Cin_pad, Lzp)  exemplar images, spatial flattened (row stride Wz), zero padded
    x_ref  : (nb, Cin_pad, Lxp)  search images,   spatial flattened (row stride Wx), zero padded
    w_ref  : (Cout, K*K*Cin_pad) conv weights, row order (kh, kw, cin_pad)  (pad rows are zero)
    b_ref  : (Cout, 1)           conv bias
    o_ref  : (nb, 1, Lr_pad)     response rows, flattened with row stride Wx, lane padded
    col_ref: (K*K*Cin_pad, nb*(Lz_slab+Lx_slab))  VMEM im2col scratch, per-sample [z|x] slabs
    """
    Lsamp = Lz_slab + Lx_slab
    Cout = w_ref.shape[0]

    # ---- im2col: full-sublane, lane-aligned dense stores into the shared scratch ----
    for n in range(nb):
        zbase = n * Lsamp
        xbase = n * Lsamp + Lz_slab
        for kh in range(K):
            for kw in range(K):
                row = (kh * K + kw) * Cin_pad
                oz = kh * Wz + kw
                ox = kh * Wx + kw
                col_ref[pl.ds(row, Cin_pad), pl.ds(zbase, Lz_slab)] = \
                    z_ref[n, :, oz:oz + Lz_slab]
                col_ref[pl.ds(row, Cin_pad), pl.ds(xbase, Lx_slab)] = \
                    x_ref[n, :, ox:ox + Lx_slab]

    # ---- backbone: ONE fused MXU matmul for z and x of all nb samples ---------------
    feat = jnp.dot(w_ref[...], col_ref[...], preferred_element_type=jnp.float32)
    feat = jnp.maximum(feat + b_ref[...], 0.0)          # (Cout, nb*Lsamp), f32

    # ---- head: SiamFC cross-correlation per sample -----------------------------------
    # resp[l] = sum_c sum_{kh,kw} zfeat[c, kh*Wz+kw] * xfeat[c, kh*Wx+kw + l]
    NACC = 4
    for n in range(nb):
        zoff = n * Lsamp
        xoff = n * Lsamp + Lz_slab
        accs = [jnp.zeros((Cout, Lr_pad), jnp.float32) for _ in range(NACC)]
        it = 0
        for kh in range(Hzf):
            # Hoist one wide row slab per kh; kw windows slice this small slab only.
            xrow = feat[:, xoff + kh * Wx: xoff + kh * Wx + Lr_pad + Wzf - 1]
            for kw in range(Wzf):
                zc = feat[:, zoff + kh * Wz + kw: zoff + kh * Wz + kw + 1]   # (Cout, 1)
                xs = xrow[:, kw: kw + Lr_pad]                                # (Cout, Lr_pad)
                accs[it % NACC] = accs[it % NACC] + zc * xs
                it += 1
        acc = (accs[0] + accs[1]) + (accs[2] + accs[3])
        resp = jnp.sum(acc, axis=0, keepdims=True) * _OUT_SCALE             # (1, Lr_pad)
        o_ref[n] = resp.astype(o_ref.dtype)


def net_forward(z, x, w, b):
    """z: (B,Cin,Hz,Wz), x: (B,Cin,Hx,Wx), w: (Cout,Cin,K,K), b: (Cout,)."""
    B, Cin, Hz, Wz = z.shape
    _, _, Hx, Wx = x.shape
    Cout, _, K, _ = w.shape

    Hzf, Wzf = Hz - K + 1, Wz - K + 1          # exemplar feature map
    Hxf, Wxf = Hx - K + 1, Wx - K + 1          # search feature map
    Ho, Wo = Hxf - Hzf + 1, Wxf - Wzf + 1      # response map

    Cin_pad = _round_up(Cin, 8)                # full-sublane im2col groups
    CKK = K * K * Cin_pad

    Lr_pad = _round_up(Ho * Wx, 128)                               # lane-dense response slab
    Lz_slab = _round_up((Hzf - 1) * Wz + Wzf, 128)                 # z-feature columns
    Lx_slab = _round_up((Hzf - 1) * Wx + (Wzf - 1) + Lr_pad, 128)  # x-feature columns
    Lzp = _round_up(Lz_slab + (K - 1) * Wz + (K - 1), 128)         # padded z image length
    Lxp = _round_up(Lx_slab + (K - 1) * Wx + (K - 1), 128)         # padded x image length

    # Static invariants: every column the head reads is a column the conv produced, and
    # every conv column reads only in-bounds (zero-padded) input; the wrapper crop below
    # (reshape to (Ho, Wx) then [:, :Wo]) relies on these exact relations.
    assert Ho * Wx <= Lr_pad
    assert (Hzf - 1) * Wz + (Wzf - 1) < Lz_slab
    assert (Hzf - 1) * Wx + (Wzf - 1) + Lr_pad <= Lx_slab
    assert Lz_slab + (K - 1) * Wz + (K - 1) <= Lzp
    assert Lx_slab + (K - 1) * Wx + (K - 1) <= Lxp
    assert Hz * Wz <= Lzp and Hx * Wx <= Lxp

    # Pack samples per grid step to amortise per-step overhead, but keep >= 2 grid steps
    # whenever possible so v7x's two TensorCores both get work.
    num_steps = 2 if B >= 2 else 1
    nb = -(-B // num_steps)
    B_pad = num_steps * nb
    Lsamp = Lz_slab + Lx_slab

    # Wrapper-side layout plumbing (free XLA pad/reshape/transpose).
    def prep(img, H, W, Lp):
        arr = img.astype(jnp.float32)
        arr = jnp.pad(arr, ((0, B_pad - B), (0, Cin_pad - Cin), (0, 0), (0, 0)))
        arr = arr.reshape(B_pad, Cin_pad, H * W)
        return jnp.pad(arr, ((0, 0), (0, 0), (0, Lp - H * W)))

    z_flat = prep(z, Hz, Wz, Lzp)
    x_flat = prep(x, Hx, Wx, Lxp)

    w_mat = jnp.pad(w.astype(jnp.float32), ((0, 0), (0, Cin_pad - Cin), (0, 0), (0, 0)))
    w_mat = jnp.transpose(w_mat, (0, 2, 3, 1)).reshape(Cout, CKK)   # (kh, kw, cin_pad) order
    b_col = b.astype(jnp.float32).reshape(Cout, 1)

    kernel = functools.partial(
        _fused_tracker_kernel, nb=nb, Cin_pad=Cin_pad, K=K, Wz=Wz, Wx=Wx,
        Hzf=Hzf, Wzf=Wzf, Lz_slab=Lz_slab, Lx_slab=Lx_slab, Lr_pad=Lr_pad)

    out = pl.pallas_call(
        kernel,
        out_shape=jax.ShapeDtypeStruct((B_pad, 1, Lr_pad), jnp.float32),
        grid=(num_steps,),
        in_specs=[
            pl.BlockSpec((nb, Cin_pad, Lzp), lambda i: (i, 0, 0)),
            pl.BlockSpec((nb, Cin_pad, Lxp), lambda i: (i, 0, 0)),
            pl.BlockSpec((Cout, CKK), lambda i: (0, 0)),   # revisited -> DMA'd once
            pl.BlockSpec((Cout, 1), lambda i: (0, 0)),     # revisited -> DMA'd once
        ],
        out_specs=pl.BlockSpec((nb, 1, Lr_pad), lambda i: (i, 0, 0)),
        scratch_shapes=[pltpu.VMEM((CKK, nb * Lsamp), jnp.float32)],
        compiler_params=pltpu.CompilerParams(
            dimension_semantics=("parallel",)),
    )(z_flat, x_flat, w_mat, b_col)

    # Crop batch / lane padding: (B_pad, 1, Lr_pad) -> (B, 1, Ho, Wo)
    return out[:B, :, :Ho * Wx].reshape(B, 1, Ho, Wx)[:, :, :, :Wo]


# Pure-JAX reference for verification.
def ref_forward(z, x, w, b):
    def conv(inp):
        out = jax.lax.conv_general_dilated(
            inp, w, (1, 1), "VALID",
            dimension_numbers=("NCHW", "OIHW", "NCHW"))
        return jnp.maximum(out + b[None, :, None, None], 0.0)

    zf, xf = conv(z), conv(x)

    def one(zb, xb):
        r = jax.lax.conv_general_dilated(
            xb[None], zb[None], (1, 1), "VALID",
            dimension_numbers=("NCHW", "OIHW", "NCHW"))
        return r[0]

    return jax.vmap(one)(zf, xf) * _OUT_SCALE


if __name__ == "__main__":
    # Small deterministic shapes: exemplar z 8x8, search x 16x16.
    B, Cin, Cout, K = 2, 3, 8, 3
    key = jax.random.PRNGKey(0)
    kz, kx, kw, kb = jax.random.split(key, 4)

    z = jax.random.normal(kz, (B, Cin, 8, 8), dtype=jnp.float32)
    x = jax.random.normal(kx, (B, Cin, 16, 16), dtype=jnp.float32)
    w = 0.1 * jax.random.normal(kw, (Cout, Cin, K, K), dtype=jnp.float32)
    b = 0.01 * jax.random.normal(kb, (Cout,), dtype=jnp.float32)

    out = jax.block_until_ready(net_forward(z, x, w, b))
    ref = jax.block_until_ready(ref_forward(z, x, w, b))

    assert out.shape == (B, 1, 9, 9), out.shape
    err = float(jnp.max(jnp.abs(out - ref)))
    assert jnp.allclose(out, ref, atol=1e-4, rtol=1e-4), err
    print("KERNEL_OK")
</pallas_src>

<mosaic_0001>
module attributes {stable_mosaic.version = 11 : i64} {
  func.func @_fused_tracker_kernel(%arg0: i32, %arg1: memref<1x8x256xf32, #tpu.memory_space<vmem>>, %arg2: memref<1x8x512xf32, #tpu.memory_space<vmem>>, %arg3: memref<8x72xf32, #tpu.memory_space<vmem>>, %arg4: memref<8x1xf32, #tpu.memory_space<vmem>>, %arg5: memref<1x1x256xf32, #tpu.memory_space<vmem>>, %arg6: memref<72x512xf32, #tpu.memory_space<vmem>>) attributes {dimension_semantics = [#tpu.dimension_semantics<parallel>], iteration_bounds = array<i64: 2>, scalar_prefetch = 0 : i64, scratch_operands = 1 : i64, tpu.core_type = #tpu.core_type<tc>, window_params = [{transform_indices = @transform_0, window_bounds = array<i64: 1, 8, 256>}, {transform_indices = @transform_1, window_bounds = array<i64: 1, 8, 512>}, {pipeline_mode = #tpu.pipeline_mode<synchronous>, transform_indices = @transform_2, window_bounds = array<i64: 8, 72>}, {pipeline_mode = #tpu.pipeline_mode<synchronous>, transform_indices = @transform_3, window_bounds = array<i64: 8, 1>}, {transform_indices = @transform_4, window_bounds = array<i64: 1, 1, 256>}]} {
    %c0 = arith.constant 0 : index
    %c0_0 = arith.constant 0 : index
    %c0_1 = arith.constant 0 : index
    %0 = vector.load %arg1[%c0, %c0_0, %c0_1] : memref<1x8x256xf32, #tpu.memory_space<vmem>>, vector<1x8x128xf32>
    %1 = vector.shape_cast %0 : vector<1x8x128xf32> to vector<8x128xf32>
    %c0_2 = arith.constant 0 : index
    %c0_3 = arith.constant 0 : index
    %2 = vector.load %arg6[%c0_2, %c0_3] : memref<72x512xf32, #tpu.memory_space<vmem>>, vector<8x128xf32>
    tpu.vector_store %arg6[%c0_2, %c0_3], %1 {strides = array<i32>} : memref<72x512xf32, #tpu.memory_space<vmem>>, vector<8x128xf32>,
    %c0_4 = arith.constant 0 : index
    %c0_5 = arith.constant 0 : index
    %c0_6 = arith.constant 0 : index
    %3 = vector.load %arg2[%c0_4, %c0_5, %c0_6] : memref<1x8x512xf32, #tpu.memory_space<vmem>>, vector<1x8x384xf32>
    %4 = vector.shape_cast %3 : vector<1x8x384xf32> to vector<8x384xf32>
    %c0_7 = arith.constant 0 : index
    %c128 = arith.constant 128 : index
    %5 = vector.load %arg6[%c0_7, %c128] : memref<72x512xf32, #tpu.memory_space<vmem>>, vector<8x384xf32>
    tpu.vector_store %arg6[%c0_7, %c128], %4 {strides = array<i32>} : memref<72x512xf32, #tpu.memory_space<vmem>>, vector<8x384xf32>,
    %c0_8 = arith.constant 0 : index
    %c0_9 = arith.constant 0 : index
    %c1 = arith.constant 1 : index
    %6 = vector.load %arg1[%c0_8, %c0_9, %c1] : memref<1x8x256xf32, #tpu.memory_space<vmem>>, vector<1x8x128xf32>
    %7 = vector.shape_cast %6 : vector<1x8x128xf32> to vector<8x128xf32>
    %c8 = arith.constant 8 : index
    %c0_10 = arith.constant 0 : index
    %8 = vector.load %arg6[%c8, %c0_10] : memref<72x512xf32, #tpu.memory_space<vmem>>, vector<8x128xf32>
    tpu.vector_store %arg6[%c8, %c0_10], %7 {strides = array<i32>} : memref<72x512xf32, #tpu.memory_space<vmem>>, vector<8x128xf32>,
    %c0_11 = arith.constant 0 : index
    %c0_12 = arith.constant 0 : index
    %c1_13 = arith.constant 1 : index
    %9 = vector.load %arg2[%c0_11, %c0_12, %c1_13] : memref<1x8x512xf32, #tpu.memory_space<vmem>>, vector<1x8x384xf32>
    %10 = vector.shape_cast %9 : vector<1x8x384xf32> to vector<8x384xf32>
    %c8_14 = arith.constant 8 : index
    %c128_15 = arith.constant 128 : index
    %11 = vector.load %arg6[%c8_14, %c128_15] : memref<72x512xf32, #tpu.memory_space<vmem>>, vector<8x384xf32>
    tpu.vector_store %arg6[%c8_14, %c128_15], %10 {strides = array<i32>} : memref<72x512xf32, #tpu.memory_space<vmem>>, vector<8x384xf32>,
    %c0_16 = arith.constant 0 : index
    %c0_17 = arith.constant 0 : index
    %c2 = arith.constant 2 : index
    %12 = vector.load %arg1[%c0_16, %c0_17, %c2] : memref<1x8x256xf32, #tpu.memory_space<vmem>>, vector<1x8x128xf32>
    %13 = vector.shape_cast %12 : vector<1x8x128xf32> to vector<8x128xf32>
    %c16 = arith.constant 16 : index
    %c0_18 = arith.constant 0 : index
    %14 = vector.load %arg6[%c16, %c0_18] : memref<72x512xf32, #tpu.memory_space<vmem>>, vector<8x128xf32>
    tpu.vector_store %arg6[%c16, %c0_18], %13 {strides = array<i32>} : memref<72x512xf32, #tpu.memory_space<vmem>>, vector<8x128xf32>,
    %c0_19 = arith.constant 0 : index
    %c0_20 = arith.constant 0 : index
    %c2_21 = arith.constant 2 : index
    %15 = vector.load %arg2[%c0_19, %c0_20, %c2_21] : memref<1x8x512xf32, #tpu.memory_space<vmem>>, vector<1x8x384xf32>
    %16 = vector.shape_cast %15 : vector<1x8x384xf32> to vector<8x384xf32>
    %c16_22 = arith.constant 16 : index
    %c128_23 = arith.constant 128 : index
    %17 = vector.load %arg6[%c16_22, %c128_23] : memref<72x512xf32, #tpu.memory_space<vmem>>, vector<8x384xf32>
    tpu.vector_store %arg6[%c16_22, %c128_23], %16 {strides = array<i32>} : memref<72x512xf32, #tpu.memory_space<vmem>>, vector<8x384xf32>,
    %c0_24 = arith.constant 0 : index
    %c0_25 = arith.constant 0 : index
    %c8_26 = arith.constant 8 : index
    %18 = vector.load %arg1[%c0_24, %c0_25, %c8_26] : memref<1x8x256xf32, #tpu.memory_space<vmem>>, vector<1x8x128xf32>
    %19 = vector.shape_cast %18 : vector<1x8x128xf32> to vector<8x128xf32>
    %c24 = arith.constant 24 : index
    %c0_27 = arith.constant 0 : index
    %20 = vector.load %arg6[%c24, %c0_27] : memref<72x512xf32, #tpu.memory_space<vmem>>, vector<8x128xf32>
    tpu.vector_store %arg6[%c24, %c0_27], %19 {strides = array<i32>} : memref<72x512xf32, #tpu.memory_space<vmem>>, vector<8x128xf32>,
    %c0_28 = arith.constant 0 : index
    %c0_29 = arith.constant 0 : index
    %c16_30 = arith.constant 16 : index
    %21 = vector.load %arg2[%c0_28, %c0_29, %c16_30] : memref<1x8x512xf32, #tpu.memory_space<vmem>>, vector<1x8x384xf32>
    %22 = vector.shape_cast %21 : vector<1x8x384xf32> to vector<8x384xf32>
    %c24_31 = arith.constant 24 : index
    %c128_32 = arith.constant 128 : index
    %23 = vector.load %arg6[%c24_31, %c128_32] : memref<72x512xf32, #tpu.memory_space<vmem>>, vector<8x384xf32>
    tpu.vector_store %arg6[%c24_31, %c128_32], %22 {strides = array<i32>} : memref<72x512xf32, #tpu.memory_space<vmem>>, vector<8x384xf32>,
    %c0_33 = arith.constant 0 : index
    %c0_34 = arith.constant 0 : index
    %c9 = arith.constant 9 : index
    %24 = vector.load %arg1[%c0_33, %c0_34, %c9] : memref<1x8x256xf32, #tpu.memory_space<vmem>>, vector<1x8x128xf32>
    %25 = vector.shape_cast %24 : vector<1x8x128xf32> to vector<8x128xf32>
    %c32 = arith.constant 32 : index
    %c0_35 = arith.constant 0 : index
    %26 = vector.load %arg6[%c32, %c0_35] : memref<72x512xf32, #tpu.memory_space<vmem>>, vector<8x128xf32>
    tpu.vector_store %arg6[%c32, %c0_35], %25 {strides = array<i32>} : memref<72x512xf32, #tpu.memory_space<vmem>>, vector<8x128xf32>,
    %c0_36 = arith.constant 0 : index
    %c0_37 = arith.constant 0 : index
    %c17 = arith.constant 17 : index
    %27 = vector.load %arg2[%c0_36, %c0_37, %c17] : memref<1x8x512xf32, #tpu.memory_space<vmem>>, vector<1x8x384xf32>
    %28 = vector.shape_cast %27 : vector<1x8x384xf32> to vector<8x384xf32>
    %c32_38 = arith.constant 32 : index
    %c128_39 = arith.constant 128 : index
    %29 = vector.load %arg6[%c32_38, %c128_39] : memref<72x512xf32, #tpu.memory_space<vmem>>, vector<8x384xf32>
    tpu.vector_store %arg6[%c32_38, %c128_39], %28 {strides = array<i32>} : memref<72x512xf32, #tpu.memory_space<vmem>>, vector<8x384xf32>,
    %c0_40 = arith.constant 0 : index
    %c0_41 = arith.constant 0 : index
    %c10 = arith.constant 10 : index
    %30 = vector.load %arg1[%c0_40, %c0_41, %c10] : memref<1x8x256xf32, #tpu.memory_space<vmem>>, vector<1x8x128xf32>
    %31 = vector.shape_cast %30 : vector<1x8x128xf32> to vector<8x128xf32>
    %c40 = arith.constant 40 : index
    %c0_42 = arith.constant 0 : index
    %32 = vector.load %arg6[%c40, %c0_42] : memref<72x512xf32, #tpu.memory_space<vmem>>, vector<8x128xf32>
    tpu.vector_store %arg6[%c40, %c0_42], %31 {strides = array<i32>} : memref<72x512xf32, #tpu.memory_space<vmem>>, vector<8x128xf32>,
    %c0_43 = arith.constant 0 : index
    %c0_44 = arith.constant 0 : index
    %c18 = arith.constant 18 : index
    %33 = vector.load %arg2[%c0_43, %c0_44, %c18] : memref<1x8x512xf32, #tpu.memory_space<vmem>>, vector<1x8x384xf32>
    %34 = vector.shape_cast %33 : vector<1x8x384xf32> to vector<8x384xf32>
    %c40_45 = arith.constant 40 : index
    %c128_46 = arith.constant 128 : index
    %35 = vector.load %arg6[%c40_45, %c128_46] : memref<72x512xf32, #tpu.memory_space<vmem>>, vector<8x384xf32>
    tpu.vector_store %arg6[%c40_45, %c128_46], %34 {strides = array<i32>} : memref<72x512xf32, #tpu.memory_space<vmem>>, vector<8x384xf32>,
    %c0_47 = arith.constant 0 : index
    %c0_48 = arith.constant 0 : index
    %c16_49 = arith.constant 16 : index
    %36 = vector.load %arg1[%c0_47, %c0_48, %c16_49] : memref<1x8x256xf32, #tpu.memory_space<vmem>>, vector<1x8x128xf32>
    %37 = vector.shape_cast %36 : vector<1x8x128xf32> to vector<8x128xf32>
    %c48 = arith.constant 48 : index
    %c0_50 = arith.constant 0 : index
    %38 = vector.load %arg6[%c48, %c0_50] : memref<72x512xf32, #tpu.memory_space<vmem>>, vector<8x128xf32>
    tpu.vector_store %arg6[%c48, %c0_50], %37 {strides = array<i32>} : memref<72x512xf32, #tpu.memory_space<vmem>>, vector<8x128xf32>,
    %c0_51 = arith.constant 0 : index
    %c0_52 = arith.constant 0 : index
    %c32_53 = arith.constant 32 : index
    %39 = vector.load %arg2[%c0_51, %c0_52, %c32_53] : memref<1x8x512xf32, #tpu.memory_space<vmem>>, vector<1x8x384xf32>
    %40 = vector.shape_cast %39 : vector<1x8x384xf32> to vector<8x384xf32>
    %c48_54 = arith.constant 48 : index
    %c128_55 = arith.constant 128 : index
    %41 = vector.load %arg6[%c48_54, %c128_55] : memref<72x512xf32, #tpu.memory_space<vmem>>, vector<8x384xf32>
    tpu.vector_store %arg6[%c48_54, %c128_55], %40 {strides = array<i32>} : memref<72x512xf32, #tpu.memory_space<vmem>>, vector<8x384xf32>,
    %c0_56 = arith.constant 0 : index
    %c0_57 = arith.constant 0 : index
    %c17_58 = arith.constant 17 : index
    %42 = vector.load %arg1[%c0_56, %c0_57, %c17_58] : memref<1x8x256xf32, #tpu.memory_space<vmem>>, vector<1x8x128xf32>
    %43 = vector.shape_cast %42 : vector<1x8x128xf32> to vector<8x128xf32>
    %c56 = arith.constant 56 : index
    %c0_59 = arith.constant 0 : index
    %44 = vector.load %arg6[%c56, %c0_59] : memref<72x512xf32, #tpu.memory_space<vmem>>, vector<8x128xf32>
    tpu.vector_store %arg6[%c56, %c0_59], %43 {strides = array<i32>} : memref<72x512xf32, #tpu.memory_space<vmem>>, vector<8x128xf32>,
    %c0_60 = arith.constant 0 : index
    %c0_61 = arith.constant 0 : index
    %c33 = arith.constant 33 : index
    %45 = vector.load %arg2[%c0_60, %c0_61, %c33] : memref<1x8x512xf32, #tpu.memory_space<vmem>>, vector<1x8x384xf32>
    %46 = vector.shape_cast %45 : vector<1x8x384xf32> to vector<8x384xf32>
    %c56_62 = arith.constant 56 : index
    %c128_63 = arith.constant 128 : index
    %47 = vector.load %arg6[%c56_62, %c128_63] : memref<72x512xf32, #tpu.memory_space<vmem>>, vector<8x384xf32>
    tpu.vector_store %arg6[%c56_62, %c128_63], %46 {strides = array<i32>} : memref<72x512xf32, #tpu.memory_space<vmem>>, vector<8x384xf32>,
    %c0_64 = arith.constant 0 : index
    %c0_65 = arith.constant 0 : index
    %c18_66 = arith.constant 18 : index
    %48 = vector.load %arg1[%c0_64, %c0_65, %c18_66] : memref<1x8x256xf32, #tpu.memory_space<vmem>>, vector<1x8x128xf32>
    %49 = vector.shape_cast %48 : vector<1x8x128xf32> to vector<8x128xf32>
    %c64 = arith.constant 64 : index
    %c0_67 = arith.constant 0 : index
    %50 = vector.load %arg6[%c64, %c0_67] : memref<72x512xf32, #tpu.memory_space<vmem>>, vector<8x128xf32>
    tpu.vector_store %arg6[%c64, %c0_67], %49 {strides = array<i32>} : memref<72x512xf32, #tpu.memory_space<vmem>>, vector<8x128xf32>,
    %c0_68 = arith.constant 0 : index
    %c0_69 = arith.constant 0 : index
    %c34 = arith.constant 34 : index
    %51 = vector.load %arg2[%c0_68, %c0_69, %c34] : memref<1x8x512xf32, #tpu.memory_space<vmem>>, vector<1x8x384xf32>
    %52 = vector.shape_cast %51 : vector<1x8x384xf32> to vector<8x384xf32>
    %c64_70 = arith.constant 64 : index
    %c128_71 = arith.constant 128 : index
    %53 = vector.load %arg6[%c64_70, %c128_71] : memref<72x512xf32, #tpu.memory_space<vmem>>, vector<8x384xf32>
    tpu.vector_store %arg6[%c64_70, %c128_71], %52 {strides = array<i32>} : memref<72x512xf32, #tpu.memory_space<vmem>>, vector<8x384xf32>,
    %c0_72 = arith.constant 0 : index
    %c0_73 = arith.constant 0 : index
    %54 = vector.load %arg3[%c0_72, %c0_73] : memref<8x72xf32, #tpu.memory_space<vmem>>, vector<8x72xf32>
    %c0_74 = arith.constant 0 : index
    %c0_75 = arith.constant 0 : index
    %55 = vector.load %arg6[%c0_74, %c0_75] : memref<72x512xf32, #tpu.memory_space<vmem>>, vector<72x512xf32>
    %cst = arith.constant dense<0.000000e+00> : vector<8x512xf32>
    %56 = tpu.matmul %54, %55, %cst {dimension_numbers = #tpu.dot_dimension_numbers<[1], [0], [0], [1], [0, 0, 1, 1], [], []>} : vector<8x72xf32>, vector<72x512xf32>, vector<8x512xf32> -> vector<8x512xf32>
    %c0_76 = arith.constant 0 : index
    %c0_77 = arith.constant 0 : index
    %57 = vector.load %arg4[%c0_76, %c0_77] : memref<8x1xf32, #tpu.memory_space<vmem>>, vector<8x1xf32>
    %58 = vector.broadcast %57 : vector<8x1xf32> to vector<8x512xf32>
    %59 = arith.addf %56, %58 : vector<8x512xf32>
    %cst_78 = arith.constant 0.000000e+00 : f32
    %60 = vector.broadcast %cst_78 : f32 to vector<8x512xf32>
    %61 = arith.maximumf %59, %60 : vector<8x512xf32>
    %cst_79 = arith.constant 0.000000e+00 : f32
    %62 = vector.broadcast %cst_79 : f32 to vector<8x256xf32>
    %cst_80 = arith.constant 0.000000e+00 : f32
    %63 = vector.broadcast %cst_80 : f32 to vector<8x256xf32>
    %cst_81 = arith.constant 0.000000e+00 : f32
    %64 = vector.broadcast %cst_81 : f32 to vector<8x256xf32>
    %cst_82 = arith.constant 0.000000e+00 : f32
    %65 = vector.broadcast %cst_82 : f32 to vector<8x256xf32>
    %66 = vector.extract_strided_slice %61 {offsets = [0, 128], sizes = [8, 261], strides = [1, 1]} : vector<8x512xf32> to vector<8x261xf32>
    %67 = vector.extract_strided_slice %61 {offsets = [0, 0], sizes = [8, 1], strides = [1, 1]} : vector<8x512xf32> to vector<8x1xf32>
    %68 = vector.extract_strided_slice %66 {offsets = [0, 0], sizes = [8, 256], strides = [1, 1]} : vector<8x261xf32> to vector<8x256xf32>
    %69 = vector.broadcast %67 : vector<8x1xf32> to vector<8x256xf32>
    %70 = arith.mulf %69, %68 : vector<8x256xf32>
    %71 = arith.addf %62, %70 : vector<8x256xf32>
    %72 = vector.extract_strided_slice %61 {offsets = [0, 1], sizes = [8, 1], strides = [1, 1]} : vector<8x512xf32> to vector<8x1xf32>
    %73 = vector.extract_strided_slice %66 {offsets = [0, 1], sizes = [8, 256], strides = [1, 1]} : vector<8x261xf32> to vector<8x256xf32>
    %74 = vector.broadcast %72 : vector<8x1xf32> to vector<8x256xf32>
    %75 = arith.mulf %74, %73 : vector<8x256xf32>
    %76 = arith.addf %63, %75 : vector<8x256xf32>
    %77 = vector.extract_strided_slice %61 {offsets = [0, 2], sizes = [8, 1], strides = [1, 1]} : vector<8x512xf32> to vector<8x1xf32>
    %78 = vector.extract_strided_slice %66 {offsets = [0, 2], sizes = [8, 256], strides = [1, 1]} : vector<8x261xf32> to vector<8x256xf32>
    %79 = vector.broadcast %77 : vector<8x1xf32> to vector<8x256xf32>
    %80 = arith.mulf %79, %78 : vector<8x256xf32>
    %81 = arith.addf %64, %80 : vector<8x256xf32>
    %82 = vector.extract_strided_slice %61 {offsets = [0, 3], sizes = [8, 1], strides = [1, 1]} : vector<8x512xf32> to vector<8x1xf32>
    %83 = vector.extract_strided_slice %66 {offsets = [0, 3], sizes = [8, 256], strides = [1, 1]} : vector<8x261xf32> to vector<8x256xf32>
    %84 = vector.broadcast %82 : vector<8x1xf32> to vector<8x256xf32>
    %85 = arith.mulf %84, %83 : vector<8x256xf32>
    %86 = arith.addf %65, %85 : vector<8x256xf32>
    %87 = vector.extract_strided_slice %61 {offsets = [0, 4], sizes = [8, 1], strides = [1, 1]} : vector<8x512xf32> to vector<8x1xf32>
    %88 = vector.extract_strided_slice %66 {offsets = [0, 4], sizes = [8, 256], strides = [1, 1]} : vector<8x261xf32> to vector<8x256xf32>
    %89 = vector.broadcast %87 : vector<8x1xf32> to vector<8x256xf32>
    %90 = arith.mulf %89, %88 : vector<8x256xf32>
    %91 = arith.addf %71, %90 : vector<8x256xf32>
    %92 = vector.extract_strided_slice %61 {offsets = [0, 5], sizes = [8, 1], strides = [1, 1]} : vector<8x512xf32> to vector<8x1xf32>
    %93 = vector.extract_strided_slice %66 {offsets = [0, 5], sizes = [8, 256], strides = [1, 1]} : vector<8x261xf32> to vector<8x256xf32>
    %94 = vector.broadcast %92 : vector<8x1xf32> to vector<8x256xf32>
    %95 = arith.mulf %94, %93 : vector<8x256xf32>
    %96 = arith.addf %76, %95 : vector<8x256xf32>
    %97 = vector.extract_strided_slice %61 {offsets = [0, 144], sizes = [8, 261], strides = [1, 1]} : vector<8x512xf32> to vector<8x261xf32>
    %98 = vector.extract_strided_slice %61 {offsets = [0, 8], sizes = [8, 1], strides = [1, 1]} : vector<8x512xf32> to vector<8x1xf32>
    %99 = vector.extract_strided_slice %97 {offsets = [0, 0], sizes = [8, 256], strides = [1, 1]} : vector<8x261xf32> to vector<8x256xf32>
    %100 = vector.broadcast %98 : vector<8x1xf32> to vector<8x256xf32>
    %101 = arith.mulf %100, %99 : vector<8x256xf32>
    %102 = arith.addf %81, %101 : vector<8x256xf32>
    %103 = vector.extract_strided_slice %61 {offsets = [0, 9], sizes = [8, 1], strides = [1, 1]} : vector<8x512xf32> to vector<8x1xf32>
    %104 = vector.extract_strided_slice %97 {offsets = [0, 1], sizes = [8, 256], strides = [1, 1]} : vector<8x261xf32> to vector<8x256xf32>
    %105 = vector.broadcast %103 : vector<8x1xf32> to vector<8x256xf32>
    %106 = arith.mulf %105, %104 : vector<8x256xf32>
    %107 = arith.addf %86, %106 : vector<8x256xf32>
    %108 = vector.extract_strided_slice %61 {offsets = [0, 10], sizes = [8, 1], strides = [1, 1]} : vector<8x512xf32> to vector<8x1xf32>
    %109 = vector.extract_strided_slice %97 {offsets = [0, 2], sizes = [8, 256], strides = [1, 1]} : vector<8x261xf32> to vector<8x256xf32>
    %110 = vector.broadcast %108 : vector<8x1xf32> to vector<8x256xf32>
    %111 = arith.mulf %110, %109 : vector<8x256xf32>
    %112 = arith.addf %91, %111 : vector<8x256xf32>
    %113 = vector.extract_strided_slice %61 {offsets = [0, 11], sizes = [8, 1], strides = [1, 1]} : vector<8x512xf32> to vector<8x1xf32>
    %114 = vector.extract_strided_slice %97 {offsets = [0, 3], sizes = [8, 256], strides = [1, 1]} : vector<8x261xf32> to vector<8x256xf32>
    %115 = vector.broadcast %113 : vector<8x1xf32> to vector<8x256xf32>
    %116 = arith.mulf %115, %114 : vector<8x256xf32>
    %117 = arith.addf %96, %116 : vector<8x256xf32>
    %118 = vector.extract_strided_slice %61 {offsets = [0, 12], sizes = [8, 1], strides = [1, 1]} : vector<8x512xf32> to vector<8x1xf32>
    %119 = vector.extract_strided_slice %97 {offsets = [0, 4], sizes = [8, 256], strides = [1, 1]} : vector<8x261xf32> to vector<8x256xf32>
    %120 = vector.broadcast %118 : vector<8x1xf32> to vector<8x256xf32>
    %121 = arith.mulf %120, %119 : vector<8x256xf32>
    %122 = arith.addf %102, %121 : vector<8x256xf32>
    %123 = vector.extract_strided_slice %61 {offsets = [0, 13], sizes = [8, 1], strides = [1, 1]} : vector<8x512xf32> to vector<8x1xf32>
    %124 = vector.extract_strided_slice %97 {offsets = [0, 5], sizes = [8, 256], strides = [1, 1]} : vector<8x261xf32> to vector<8x256xf32>
    %125 = vector.broadcast %123 : vector<8x1xf32> to vector<8x256xf32>
    %126 = arith.mulf %125, %124 : vector<8x256xf32>
    %127 = arith.addf %107, %126 : vector<8x256xf32>
    %128 = vector.extract_strided_slice %61 {offsets = [0, 160], sizes = [8, 261], strides = [1, 1]} : vector<8x512xf32> to vector<8x261xf32>
    %129 = vector.extract_strided_slice %61 {offsets = [0, 16], sizes = [8, 1], strides = [1, 1]} : vector<8x512xf32> to vector<8x1xf32>
    %130 = vector.extract_strided_slice %128 {offsets = [0, 0], sizes = [8, 256], strides = [1, 1]} : vector<8x261xf32> to vector<8x256xf32>
    %131 = vector.broadcast %129 : vector<8x1xf32> to vector<8x256xf32>
    %132 = arith.mulf %131, %130 : vector<8x256xf32>
    %133 = arith.addf %112, %132 : vector<8x256xf32>
    %134 = vector.extract_strided_slice %61 {offsets = [0, 17], sizes = [8, 1], strides = [1, 1]} : vector<8x512xf32> to vector<8x1xf32>
    %135 = vector.extract_strided_slice %128 {offsets = [0, 1], sizes = [8, 256], strides = [1, 1]} : vector<8x261xf32> to vector<8x256xf32>
    %136 = vector.broadcast %134 : vector<8x1xf32> to vector<8x256xf32>
    %137 = arith.mulf %136, %135 : vector<8x256xf32>
    %138 = arith.addf %117, %137 : vector<8x256xf32>
    %139 = vector.extract_strided_slice %61 {offsets = [0, 18], sizes = [8, 1], strides = [1, 1]} : vector<8x512xf32> to vector<8x1xf32>
    %140 = vector.extract_strided_slice %128 {offsets = [0, 2], sizes = [8, 256], strides = [1, 1]} : vector<8x261xf32> to vector<8x256xf32>
    %141 = vector.broadcast %139 : vector<8x1xf32> to vector<8x256xf32>
    %142 = arith.mulf %141, %140 : vector<8x256xf32>
    %143 = arith.addf %122, %142 : vector<8x256xf32>
    %144 = vector.extract_strided_slice %61 {offsets = [0, 19], sizes = [8, 1], strides = [1, 1]} : vector<8x512xf32> to vector<8x1xf32>
    %145 = vector.extract_strided_slice %128 {offsets = [0, 3], sizes = [8, 256], strides = [1, 1]} : vector<8x261xf32> to vector<8x256xf32>
    %146 = vector.broadcast %144 : vector<8x1xf32> to vector<8x256xf32>
    %147 = arith.mulf %146, %145 : vector<8x256xf32>
    %148 = arith.addf %127, %147 : vector<8x256xf32>
    %149 = vector.extract_strided_slice %61 {offsets = [0, 20], sizes = [8, 1], strides = [1, 1]} : vector<8x512xf32> to vector<8x1xf32>
    %150 = vector.extract_strided_slice %128 {offsets = [0, 4], sizes = [8, 256], strides = [1, 1]} : vector<8x261xf32> to vector<8x256xf32>
    %151 = vector.broadcast %149 : vector<8x1xf32> to vector<8x256xf32>
    %152 = arith.mulf %151, %150 : vector<8x256xf32>
    %153 = arith.addf %133, %152 : vector<8x256xf32>
    %154 = vector.extract_strided_slice %61 {offsets = [0, 21], sizes = [8, 1], strides = [1, 1]} : vector<8x512xf32> to vector<8x1xf32>
    %155 = vector.extract_strided_slice %128 {offsets = [0, 5], sizes = [8, 256], strides = [1, 1]} : vector<8x261xf32> to vector<8x256xf32>
    %156 = vector.broadcast %154 : vector<8x1xf32> to vector<8x256xf32>
    %157 = arith.mulf %156, %155 : vector<8x256xf32>
    %158 = arith.addf %138, %157 : vector<8x256xf32>
    %159 = vector.extract_strided_slice %61 {offsets = [0, 176], sizes = [8, 261], strides = [1, 1]} : vector<8x512xf32> to vector<8x261xf32>
    %160 = vector.extract_strided_slice %61 {offsets = [0, 24], sizes = [8, 1], strides = [1, 1]} : vector<8x512xf32> to vector<8x1xf32>
    %161 = vector.extract_strided_slice %159 {offsets = [0, 0], sizes = [8, 256], strides = [1, 1]} : vector<8x261xf32> to vector<8x256xf32>
    %162 = vector.broadcast %160 : vector<8x1xf32> to vector<8x256xf32>
    %163 = arith.mulf %162, %161 : vector<8x256xf32>
    %164 = arith.addf %143, %163 : vector<8x256xf32>
    %165 = vector.extract_strided_slice %61 {offsets = [0, 25], sizes = [8, 1], strides = [1, 1]} : vector<8x512xf32> to vector<8x1xf32>
    %166 = vector.extract_strided_slice %159 {offsets = [0, 1], sizes = [8, 256], strides = [1, 1]} : vector<8x261xf32> to vector<8x256xf32>
    %167 = vector.broadcast %165 : vector<8x1xf32> to vector<8x256xf32>
    %168 = arith.mulf %167, %166 : vector<8x256xf32>
    %169 = arith.addf %148, %168 : vector<8x256xf32>
    %170 = vector.extract_strided_slice %61 {offsets = [0, 26], sizes = [8, 1], strides = [1, 1]} : vector<8x512xf32> to vector<8x1xf32>
    %171 = vector.extract_strided_slice %159 {offsets = [0, 2], sizes = [8, 256], strides = [1, 1]} : vector<8x261xf32> to vector<8x256xf32>
    %172 = vector.broadcast %170 : vector<8x1xf32> to vector<8x256xf32>
    %173 = arith.mulf %172, %171 : vector<8x256xf32>
    %174 = arith.addf %153, %173 : vector<8x256xf32>
    %175 = vector.extract_strided_slice %61 {offsets = [0, 27], sizes = [8, 1], strides = [1, 1]} : vector<8x512xf32> to vector<8x1xf32>
    %176 = vector.extract_strided_slice %159 {offsets = [0, 3], sizes = [8, 256], strides = [1, 1]} : vector<8x261xf32> to vector<8x256xf32>
    %177 = vector.broadcast %175 : vector<8x1xf32> to vector<8x256xf32>
    %178 = arith.mulf %177, %176 : vector<8x256xf32>
    %179 = arith.addf %158, %178 : vector<8x256xf32>
    %180 = vector.extract_strided_slice %61 {offsets = [0, 28], sizes = [8, 1], strides = [1, 1]} : vector<8x512xf32> to vector<8x1xf32>
    %181 = vector.extract_strided_slice %159 {offsets = [0, 4], sizes = [8, 256], strides = [1, 1]} : vector<8x261xf32> to vector<8x256xf32>
    %182 = vector.broadcast %180 : vector<8x1xf32> to vector<8x256xf32>
    %183 = arith.mulf %182, %181 : vector<8x256xf32>
    %184 = arith.addf %164, %183 : vector<8x256xf32>
    %185 = vector.extract_strided_slice %61 {offsets = [0, 29], sizes = [8, 1], strides = [1, 1]} : vector<8x512xf32> to vector<8x1xf32>
    %186 = vector.extract_strided_slice %159 {offsets = [0, 5], sizes = [8, 256], strides = [1, 1]} : vector<8x261xf32> to vector<8x256xf32>
    %187 = vector.broadcast %185 : vector<8x1xf32> to vector<8x256xf32>
    %188 = arith.mulf %187, %186 : vector<8x256xf32>
    %189 = arith.addf %169, %188 : vector<8x256xf32>
    %190 = vector.extract_strided_slice %61 {offsets = [0, 192], sizes = [8, 261], strides = [1, 1]} : vector<8x512xf32> to vector<8x261xf32>
    %191 = vector.extract_strided_slice %61 {offsets = [0, 32], sizes = [8, 1], strides = [1, 1]} : vector<8x512xf32> to vector<8x1xf32>
    %192 = vector.extract_strided_slice %190 {offsets = [0, 0], sizes = [8, 256], strides = [1, 1]} : vector<8x261xf32> to vector<8x256xf32>
    %193 = vector.broadcast %191 : vector<8x1xf32> to vector<8x256xf32>
    %194 = arith.mulf %193, %192 : vector<8x256xf32>
    %195 = arith.addf %174, %194 : vector<8x256xf32>
    %196 = vector.extract_strided_slice %61 {offsets = [0, 33], sizes = [8, 1], strides = [1, 1]} : vector<8x512xf32> to vector<8x1xf32>
    %197 = vector.extract_strided_slice %190 {offsets = [0, 1], sizes = [8, 256], strides = [1, 1]} : vector<8x261xf32> to vector<8x256xf32>
    %198 = vector.broadcast %196 : vector<8x1xf32> to vector<8x256xf32>
    %199 = arith.mulf %198, %197 : vector<8x256xf32>
    %200 = arith.addf %179, %199 : vector<8x256xf32>
    %201 = vector.extract_strided_slice %61 {offsets = [0, 34], sizes = [8, 1], strides = [1, 1]} : vector<8x512xf32> to vector<8x1xf32>
    %202 = vector.extract_strided_slice %190 {offsets = [0, 2], sizes = [8, 256], strides = [1, 1]} : vector<8x261xf32> to vector<8x256xf32>
    %203 = vector.broadcast %201 : vector<8x1xf32> to vector<8x256xf32>
    %204 = arith.mulf %203, %202 : vector<8x256xf32>
    %205 = arith.addf %184, %204 : vector<8x256xf32>
    %206 = vector.extract_strided_slice %61 {offsets = [0, 35], sizes = [8, 1], strides = [1, 1]} : vector<8x512xf32> to vector<8x1xf32>
    %207 = vector.extract_strided_slice %190 {offsets = [0, 3], sizes = [8, 256], strides = [1, 1]} : vector<8x261xf32> to vector<8x256xf32>
    %208 = vector.broadcast %206 : vector<8x1xf32> to vector<8x256xf32>
    %209 = arith.mulf %208, %207 : vector<8x256xf32>
    %210 = arith.addf %189, %209 : vector<8x256xf32>
    %211 = vector.extract_strided_slice %61 {offsets = [0, 36], sizes = [8, 1], strides = [1, 1]} : vector<8x512xf32> to vector<8x1xf32>
    %212 = vector.extract_strided_slice %190 {offsets = [0, 4], sizes = [8, 256], strides = [1, 1]} : vector<8x261xf32> to vector<8x256xf32>
    %213 = vector.broadcast %211 : vector<8x1xf32> to vector<8x256xf32>
    %214 = arith.mulf %213, %212 : vector<8x256xf32>
    %215 = arith.addf %195, %214 : vector<8x256xf32>
    %216 = vector.extract_strided_slice %61 {offsets = [0, 37], sizes = [8, 1], strides = [1, 1]} : vector<8x512xf32> to vector<8x1xf32>
    %217 = vector.extract_strided_slice %190 {offsets = [0, 5], sizes = [8, 256], strides = [1, 1]} : vector<8x261xf32> to vector<8x256xf32>
    %218 = vector.broadcast %216 : vector<8x1xf32> to vector<8x256xf32>
    %219 = arith.mulf %218, %217 : vector<8x256xf32>
    %220 = arith.addf %200, %219 : vector<8x256xf32>
    %221 = vector.extract_strided_slice %61 {offsets = [0, 208], sizes = [8, 261], strides = [1, 1]} : vector<8x512xf32> to vector<8x261xf32>
    %222 = vector.extract_strided_slice %61 {offsets = [0, 40], sizes = [8, 1], strides = [1, 1]} : vector<8x512xf32> to vector<8x1xf32>
    %223 = vector.extract_strided_slice %221 {offsets = [0, 0], sizes = [8, 256], strides = [1, 1]} : vector<8x261xf32> to vector<8x256xf32>
    %224 = vector.broadcast %222 : vector<8x1xf32> to vector<8x256xf32>
    %225 = arith.mulf %224, %223 : vector<8x256xf32>
    %226 = arith.addf %205, %225 : vector<8x256xf32>
    %227 = vector.extract_strided_slice %61 {offsets = [0, 41], sizes = [8, 1], strides = [1, 1]} : vector<8x512xf32> to vector<8x1xf32>
    %228 = vector.extract_strided_slice %221 {offsets = [0, 1], sizes = [8, 256], strides = [1, 1]} : vector<8x261xf32> to vector<8x256xf32>
    %229 = vector.broadcast %227 : vector<8x1xf32> to vector<8x256xf32>
    %230 = arith.mulf %229, %228 : vector<8x256xf32>
    %231 = arith.addf %210, %230 : vector<8x256xf32>
    %232 = vector.extract_strided_slice %61 {offsets = [0, 42], sizes = [8, 1], strides = [1, 1]} : vector<8x512xf32> to vector<8x1xf32>
    %233 = vector.extract_strided_slice %221 {offsets = [0, 2], sizes = [8, 256], strides = [1, 1]} : vector<8x261xf32> to vector<8x256xf32>
    %234 = vector.broadcast %232 : vector<8x1xf32> to vector<8x256xf32>
    %235 = arith.mulf %234, %233 : vector<8x256xf32>
    %236 = arith.addf %215, %235 : vector<8x256xf32>
    %237 = vector.extract_strided_slice %61 {offsets = [0, 43], sizes = [8, 1], strides = [1, 1]} : vector<8x512xf32> to vector<8x1xf32>
    %238 = vector.extract_strided_slice %221 {offsets = [0, 3], sizes = [8, 256], strides = [1, 1]} : vector<8x261xf32> to vector<8x256xf32>
    %239 = vector.broadcast %237 : vector<8x1xf32> to vector<8x256xf32>
    %240 = arith.mulf %239, %238 : vector<8x256xf32>
    %241 = arith.addf %220, %240 : vector<8x256xf32>
    %242 = vector.extract_strided_slice %61 {offsets = [0, 44], sizes = [8, 1], strides = [1, 1]} : vector<8x512xf32> to vector<8x1xf32>
    %243 = vector.extract_strided_slice %221 {offsets = [0, 4], sizes = [8, 256], strides = [1, 1]} : vector<8x261xf32> to vector<8x256xf32>
    %244 = vector.broadcast %242 : vector<8x1xf32> to vector<8x256xf32>
    %245 = arith.mulf %244, %243 : vector<8x256xf32>
    %246 = arith.addf %226, %245 : vector<8x256xf32>
    %247 = vector.extract_strided_slice %61 {offsets = [0, 45], sizes = [8, 1], strides = [1, 1]} : vector<8x512xf32> to vector<8x1xf32>
    %248 = vector.extract_strided_slice %221 {offsets = [0, 5], sizes = [8, 256], strides = [1, 1]} : vector<8x261xf32> to vector<8x256xf32>
    %249 = vector.broadcast %247 : vector<8x1xf32> to vector<8x256xf32>
    %250 = arith.mulf %249, %248 : vector<8x256xf32>
    %251 = arith.addf %231, %250 : vector<8x256xf32>
    %252 = arith.addf %236, %241 : vector<8x256xf32>
    %253 = arith.addf %246, %251 : vector<8x256xf32>
    %254 = arith.addf %252, %253 : vector<8x256xf32>
    %cst_83 = arith.constant dense<0.000000e+00> : vector<256xf32>
    %255 = vector.multi_reduction <add>, %254, %cst_83 [0] : vector<8x256xf32> to vector<256xf32>
    %256 = vector.shape_cast %255 : vector<256xf32> to vector<1x256xf32>
    %cst_84 = arith.constant 1.000000e-03 : f32
    %257 = vector.broadcast %cst_84 : f32 to vector<1x256xf32>
    %258 = arith.mulf %256, %257 : vector<1x256xf32>
    %c0_85 = arith.constant 0 : index
    %c0_86 = arith.constant 0 : index
    %c0_87 = arith.constant 0 : index
    %259 = vector.load %arg5[%c0_85, %c0_86, %c0_87] : memref<1x1x256xf32, #tpu.memory_space<vmem>>, vector<1x1x256xf32>
    %260 = vector.shape_cast %259 : vector<1x1x256xf32> to vector<1x256xf32>
    %261 = vector.shape_cast %258 : vector<1x256xf32> to vector<1x1x256xf32>
    tpu.vector_store %arg5[%c0_85, %c0_86, %c0_87], %261 {strides = array<i32>} : memref<1x1x256xf32, #tpu.memory_space<vmem>>, vector<1x1x256xf32>,
    return
  }
  func.func @transform_0(%arg0: i32) -> (i32, i32, i32) {
    %c0_i32 = arith.constant 0 : i32
    %c0_i32_0 = arith.constant 0 : i32
    %c0_i32_1 = arith.constant 0 : i32
    return %arg0, %c0_i32, %c0_i32_0 : i32, i32, i32
  }
  func.func @transform_1(%arg0: i32) -> (i32, i32, i32) {
    %c0_i32 = arith.constant 0 : i32
    %c0_i32_0 = arith.constant 0 : i32
    %c0_i32_1 = arith.constant 0 : i32
    return %arg0, %c0_i32, %c0_i32_0 : i32, i32, i32
  }
  func.func @transform_2(%arg0: i32) -> (i32, i32) {
    %c0_i32 = arith.constant 0 : i32
    %c0_i32_0 = arith.constant 0 : i32
    %c0_i32_1 = arith.constant 0 : i32
    return %c0_i32, %c0_i32_0 : i32, i32
  }
  func.func @transform_3(%arg0: i32) -> (i32, i32) {
    %c0_i32 = arith.constant 0 : i32
    %c0_i32_0 = arith.constant 0 : i32
    %c0_i32_1 = arith.constant 0 : i32
    return %c0_i32, %c0_i32_0 : i32, i32
  }
  func.func @transform_4(%arg0: i32) -> (i32, i32, i32) {
    %c0_i32 = arith.constant 0 : i32
    %c0_i32_0 = arith.constant 0 : i32
    %c0_i32_1 = arith.constant 0 : i32
    return %arg0, %c0_i32, %c0_i32_0 : i32, i32, i32
  }
}

</mosaic_0001>

<bundles_post_ra>
// kernel: tpu_custom_call.1
= control target key start
LH: loop header
LB: loop body
LE: loop exit
PB: predicated region body
PF: predicated region fallthrough
CT: control target
= control target key end

     0   :  { %s3180_s0 = inlined_call_operand.hbm [shape: f32[2,8,256], index: 0, kind: input, shape index: {}]   ;;  %s3181_s1 = inlined_call_operand.hbm [shape: f32[2,8,512], index: 1, kind: input, shape index: {}]   ;;  %s3182_s2 = inlined_call_operand.vmem [shape: f32[8,72], index: 2, kind: input, shape index: {}]   ;;  %s3183_s3 = inlined_call_operand.vmem [shape: f32[8,1], index: 3, kind: input, shape index: {}]   ;;  %s3184_s4 = inlined_call_operand.hbm [shape: f32[2,1,256], index: 4, kind: output, shape index: {}]  }
   0x1   :  { %3185 = sst [smem:[#allocation12_spill]] %s3180_s0 }
   0x2   :  { %9 = vsyncpa [#allocation4], 0 }
   0x3   :  { %11 = vsyncpa [#allocation4 + $0x1], 0 }
   0x4   :  { %12 = vsyncpa [#allocation7], 0 }
   0x5   :  { %14 = vsyncpa [#allocation7 + $0x1], 0 }
   0x6   :  { %15 = vsyncpa [#allocation5], 0 }
   0x7   :  { %17 = vsyncpa [#allocation5 + $0x1], 0  ;;  %s2176_s15 = smov 0   ;;  %s2178_s16 = smov 0  }
   0x8   :  { %s2180_s17 = smov 0   ;;  %s2182_s18 = smov 0  }
   0x9 LB: > { %s2197_s19 = sadd.s32 4294967295, %s2093_s18   ;;  %s1675_s20 = sadd.s32 4294967294, %s2093_s18   ;;  %s2093_s18 = sphi %s2182_s18, %s3197_s18   ;;  %s2089_s17 = sphi %s2180_s17, %s3196_s17   ;;  %s2085_s16 = sphi %s2178_s16, %s3195_s16   ;;  %s2081_s15 = sphi %s2176_s15, %s3194_s15  }
   0xa   : > { %s2201_s21 = sadd.s32 1, %s2093_s18   ;;  %s30_s22 = sadd.s32 1, %s2089_s17 }
   0xb   : > { %s27_s23 = ssub.s32 %s2093_s18, %s2201_s21  ;;  %p37_p0 = scmp.ne.s32.totalorder %s2089_s17, %s2085_s16 }
   0xc   : > { %p28_p1 = scmp.eq.s32.totalorder %s27_s23, 0  ;;  %p38_p2 = scmp.eq.s32.totalorder %s2093_s18, 0 }
   0xd   : > { %p43_p3 = scmp.ne.s32.totalorder %s2085_s16, %s2081_s15  ;;  %p44_p4 = scmp.eq.s32.totalorder %s2197_s19, 0 }
   0xe   : > { %s2213_s24 = scalar_select %p28_p1, %s2089_s17, %s30_s22  }
   0xf   : > { %p2215_p5 = por %p38_p2, %p37_p0  ;;  %p2219_p6 = por %p44_p4, %p43_p3 }
  0x10   : > { %p135_p7 = scmp.eq.s32.totalorder %s2197_s19, 1  ;;  %p141_p8 = scmp.eq.s32.totalorder %s1675_s20, 1 }
  0x11   : > { %p1715_p10 = scmp.lt.s32.totalorder %s2093_s18, 2  ;;  %s2235_s29 = sand.u32 1, %s2089_s17  }
  0x12   : > { %p2226_p11 = por %p135_p7, %p37_p0  ;;  %p2230_p12 = por %p141_p8, %p43_p3 }
  0x13   : > { %s1696_s30 = sshll.u32 %s2093_s18, 4  ;;  %s1678_s5 = sshll.u32 %s2235_s29, 4 }
  0x14   : > { %s3190_s0 = sld [smem:[#allocation12_spill]]  ;;  %s171_s10 = scalar_lea.vmem [#allocation3], %s1678_s5 }
  0x15   : > { %s180_s11 = sshll.u32 %s171_s10, 4  ;;  %p2244_p13 = pnand %p1715_p10, %p2215_p5  ;;  %s181_s11 = int_to_ptr.vmem [resolvable:$true] %s180_s11 }
  0x16   : > { %p1684_p0 = scmp.ge.s32.totalorder %s2093_s18, 1  ;;  %p205_p1 = scmp.lt.s32.totalorder %s2093_s18, 3 }
  0x17   : > { %s1681_s13 = sshll.u32 %s2235_s29, 5  ;;  %s168_s14 = scalar_lea.sflag [#allocation4], %s2235_s29 }
  0x18   : > { %p1967_p3 = pneg %p2244_p13 }
  0x1a   : > { %s176_s8 = scalar_lea.hbm %s3190_s0, %s1696_s30  ;;  %s1970_s30 = scalar_lea.hbm %s3190_s0, 32 }
  0x1b   : > { %s178_s9 = sshll.u32 %s176_s8, 4  ;;  %s179_s9 = int_to_ptr.hbm [resolvable:$true] %s178_s9 }
  0x1c   : > { %s1963_s20 = sshra.s32 %s179_s9, 4  ;;  %s1964_s20 = int_to_ptr.hbm [resolvable:$true] %s1963_s20 }
  0x1d   : > { %s1965_s22 = scalar_lea.hbm %s1964_s20, 16  ;;  %p1971_p5 = scmp.lt.s32.totalorder %s1964_s20, %s3190_s0 }
  0x1e   : > { %p1966_p2 = scmp.ne.s32.totalorder %s1964_s20, %s1965_s22  ;;  %p1972_p8 = scmp.lt.s32.totalorder %s1970_s30, %s1965_s22 }
  0x20   : > { %p1968_p4 = pnand %p1967_p3, %p1966_p2  ;;  %p1973_p10 = por %p1972_p8, %p1971_p5 }
  0x22   : > { %p1969_p7 = pneg %p1968_p4 }
  0x24   : > { %p1974_p9 = pnand %p1973_p10, %p1969_p7 }
  0x26   : > { %1977 = shalt.err (!%p1974_p9)
}
  0x27   : > { %1707 = dma.hbm_to_vmem [thread:$0]  (!%p2244_p13), %s179_s9, 256, %s181_s11, %s168_s14  }
  0x28   : > { %p2269_p2 = pnand %p1684_p0, %p205_p1  ;;  %s1697_s8 = sshll.u32 %s2093_s18, 5 }
  0x29   : > { %s191_s10 = scalar_lea.vmem [#allocation6], %s1681_s13  ;;  %s196_s25 = scalar_lea.hbm %s3181_s1, %s1697_s8 }
  0x2a   : > { %s200_s20 = sshll.u32 %s191_s10, 4  ;;  %s198_s30 = sshll.u32 %s196_s25, 4  ;;  %s201_s20 = int_to_ptr.vmem [resolvable:$true] %s200_s20  ;;  %s199_s30 = int_to_ptr.hbm [resolvable:$true] %s198_s30 }
  0x2b   : > { %s188_s5 = scalar_lea.sflag [#allocation7], %s2235_s29  ;;  %s1993_s6 = sshra.s32 %s199_s30, 4  ;;  %s1994_s6 = int_to_ptr.hbm [resolvable:$true] %s1993_s6 }
  0x2c   : > { %s1995_s9 = scalar_lea.hbm %s1994_s6, 32  ;;  %s2000_s13 = scalar_lea.hbm %s3181_s1, 64 }
  0x2d   : > { %p1996_p9 = scmp.ne.s32.totalorder %s1994_s6, %s1995_s9  ;;  %p2001_p4 = scmp.lt.s32.totalorder %s1994_s6, %s3181_s1 }
  0x2e   : > { %p2002_p7 = scmp.lt.s32.totalorder %s2000_s13, %s1995_s9 }
  0x2f   : > { %p1998_p0 = pnand %p1996_p9, %p1967_p3 }
  0x30   : > { %p2003_p5 = por %p2002_p7, %p2001_p4 }
  0x31   : > { %p1999_p1 = pneg %p1998_p0 }
  0x33   : > { %p2004_p8 = pnand %p2003_p5, %p1999_p1 }
  0x35   : > { %2007 = shalt.err (!%p2004_p8)
}
  0x36   : > { %1710 = dma.hbm_to_vmem [thread:$0]  (!%p2244_p13), %s199_s30, 512, %s201_s20, %s188_s5  }
  0x37   : > { %209 = sbr.rel (%p2269_p2) target bundleno = 1168 (0x490), region = 36  ;;  %s2292_s29 = sand.u32 (!%p2269_p2), 1, %s2085_s16  }
  0x38   : > { %s1685_s8 = sshll.u32 (!%p2269_p2), %s2292_s29, 4  ;;  %s212_s22 = scalar_lea.sflag (!%p2269_p2), [#allocation4], %s2292_s29 }
  0x39   : > { %s215_s0 = scalar_lea.vmem (!%p2269_p2), [#allocation3], %s1685_s8 }
  0x3c   : > { %2068 = dma.done.wait (%p2219_p6), %s212_s22, 256  }
  0x3d   : > { %2070 = vsyncadd (%p2219_p6), %s212_s22, 4294967040  ;;  %s1686_s12 = sshll.u32 %s2292_s29, 5  ;;  %s222_s7 = scalar_lea.sflag [#allocation7], %s2292_s29 }
  0x3e   : > { %s225_s20 = scalar_lea.vmem [#allocation6], %s1686_s12 }
  0x3f   : > { %2072 = dma.done.wait (%p2219_p6), %s222_s7, 512  }
  0x40   : > { %2074 = vsyncadd (%p2219_p6), %s222_s7, 4294966784  ;;  %v2306_v0 = vld [vmem:[%s225_s20 + $0x10] sm:$0xff]  ;;  %v279_v1 = vld [vmem:[%s225_s20 + $0x18] sm:$0xff]  ;;  %s2095_s23 = smov 127   ;;  %s2096_s26 = smov 126   ;;  %vm553_vm0 = vcmask 769024  }
  0x41   : > { %v2308_v2 = vld [vmem:[%s215_s0] sm:$0xff]  ;;  %v1815_v3 = vpack.i.bf16 %v279_v1, %v2306_v0  ;;  %v265_v4 = vld [vmem:[%s215_s0 + $0x8] sm:$0xff]  ;;  %s2097_s25 = smov 112   ;;  %s2098_s30 = smov 120   ;;  %vm516_vm1 = vcmask 777216   ;;  %vm479_vm2 = vcmask 785408  }
  0x42   : > { %v2311_v5 = vld [vmem:[%s225_s20] sm:$0xff]  ;;  %v2313_v6 = vld [vmem:[%s225_s20 + $0x8] sm:$0xff]  ;;  %v1805_v7 = vpack.i.bf16 %v265_v4, %v2308_v2  ;;  %s2099_s5 = smov 111   ;;  %s2100_s6 = smov 119   ;;  %vm442_vm3 = vcmask 900096   ;;  %vm404_vm4 = vcmask 908288  }
  0x43   : > { %v1810_v8 = vpack.i.bf16 %v2313_v6, %v2311_v5  ;;  %1816 = vrot.lane.b32.xlu1 %v1815_v3, %s2095_s23  ;;  %s2101_s9 = smov 110   ;;  %s2102_s11 = smov 118   ;;  %vm366_vm5 = vcmask 916480   ;;  %vm309_vm6 = vcmask 1031168   ;;  %v600_v52 = vld [vmem:[%s3183_s3] sm:$0xff]  ;;  %vm272_vm7 = vcmask 1039360  }
  0x44   : > { %1806 = vrot.lane.b32.xlu0 %v1805_v7, %s2095_s23  ;;  %s2103_s14 = smov 96   ;;  %s2104_s13 = smov 95   ;;  %v2106_v53 = vmov 0   ;;  %v2411_v57 = vld [vmem:[%s3182_s2] sm:$0xff]  ;;  %vm606_vm8 = vcmask 588800   ;;  %vm422_vm9 = vcmask 965632  }
  0x45   : > { %1826 = vrot.lane.b32.xlu2 %v1810_v8, %s2096_s26  ;;  %s2105_s10 = smov 94   ;;  %1925 = vset.pattern.permute.xlu0 %v2106_v53  ;;  %vm384_vm10 = vcmask 973824   ;;  %vm346_vm11 = vcmask 982016   ;;  %s2137_s7 = smov 124   ;;  %vm749_vm12 = vcmask 1014784   ;;  %vm796_vm13 = vcmask 932864  }
  0x46   : > { %1926 = vset.pattern.permute.xlu1 %v2106_v53  ;;  %s2139_s20 = smov 114   ;;  %vm1033_vm14 = vcmask 752640   ;;  %vm1080_vm15 = vcmask 670720  }
  0x4b   : > { %1821 = vrot.lane.b32.xlu1 %v1805_v7, %s2096_s26 }
  0x4c   : > { %1811 = vrot.lane.b32.xlu0 %v1810_v8, %s2095_s23 }
  0x4d   : > { %1831 = vrot.lane.b32.xlu2 %v1815_v3, %s2096_s26 }
  0x53   : > { %1841 = vrot.lane.b32.xlu1 %v1810_v8, %s2097_s25 }
  0x54   : > { %1836 = vrot.lane.b32.xlu0 %v1805_v7, %s2098_s30  ;;  %s2141_s30 = smov 82  }
  0x55   : > { %1846 = vrot.lane.b32.xlu2 %v1815_v3, %s2097_s25 }
  0x5b   : > { %1856 = vrot.lane.b32.xlu1 %v1810_v8, %s2099_s5 }
  0x5c   : > { %1851 = vrot.lane.b32.xlu0 %v1805_v7, %s2100_s6  ;;  %s2144_s6 = smov 64  }
  0x5d   : > { %1861 = vrot.lane.b32.xlu2 %v1815_v3, %s2099_s5 }
  0x63   : > { %1871 = vrot.lane.b32.xlu1 %v1810_v8, %s2101_s9 }
  0x64   : > { %1866 = vrot.lane.b32.xlu0 %v1805_v7, %s2102_s11  ;;  %s2146_s11 = smov 60  }
  0x65   : > { %1876 = vrot.lane.b32.xlu2 %v1815_v3, %s2101_s9 }
  0x6b   : > { %1886 = vrot.lane.b32.xlu1 %v1810_v8, %s2103_s14 }
  0x6c   : > { %1881 = vrot.lane.b32.xlu0 %v1805_v7, %s2097_s25  ;;  %s2140_s25 = smov 92  }
  0x6d   : > { %1891 = vrot.lane.b32.xlu2 %v1815_v3, %s2103_s14 }
  0x73   : > { %1901 = vrot.lane.b32.xlu1 %v1810_v8, %s2104_s13 }
  0x74   : > { %1896 = vrot.lane.b32.xlu0 %v1805_v7, %s2099_s5  ;;  %s2142_s5 = smov 78  }
  0x75   : > { %1906 = vrot.lane.b32.xlu2 %v1815_v3, %s2104_s13  ;;  %s2147_s13 = smov 50  }
  0x7b   : > { %1916 = vrot.lane.b32.xlu1 %v1810_v8, %s2105_s10 }
  0x7c   : > { %1911 = vrot.lane.b32.xlu0 %v1805_v7, %s2101_s9 }
  0x7d   : > { %1921 = vrot.lane.b32.xlu2 %v1815_v3, %s2105_s10 }
  0x84   : > { %603 = vperm.xlu0 %1925, %v600_v52  }
  0x9f   : > { %v2329_v9 = vpop.permute.xlu2 %1826 }
  0xa7   : > { %v2331_v10 = vpop.permute.xlu2 %1831 }
  0xa8   : > { %v1834_v45 = vunpack.i.h.bf16 %v2331_v10  ;;  %v1833_v46 = vunpack.i.l.bf16 %v2331_v10 }
  0xaa   : > { %v331_v51 = vsel %vm309_vm6, %v1833_v46, %v1834_v45 }
  0xaf   : > { %v2333_v11 = vpop.permute.xlu2 %1846 }
  0xb0   : > { %v1849_v40 = vunpack.i.h.bf16 %v2333_v11  ;;  %v1848_v41 = vunpack.i.l.bf16 %v2333_v11 }
  0xb2   : > { %v369_v49 = vsel %vm366_vm5, %v1848_v41, %v1849_v40 }
  0xb5   : > { %v2335_v12 = vpop.permute.xlu1 %1816 }
  0xb6   : > { %v2337_v13 = vpop.permute.xlu0 %1806  ;;  %v1819_v48 = vunpack.i.h.bf16 %v2335_v12  ;;  %v1818_v50 = vunpack.i.l.bf16 %v2335_v12  ;;  %v2107_v12 = vmov 1  }
  0xb7   : > { %v2339_v14 = vpop.permute.xlu2 %1861  ;;  %v1808_v11 = vunpack.i.l.bf16 %v2337_v13  ;;  %1927 = vset.pattern.permute.xlu2 %v2107_v12 }
  0xb8   : > { %v1864_v37 = vunpack.i.h.bf16 %v2339_v14  ;;  %v1863_v38 = vunpack.i.l.bf16 %v2339_v14  ;;  %v294_v55 = vsel %vm272_vm7, %v1818_v50, %v1819_v48 }
  0xba   : > { %v407_v47 = vsel %vm404_vm4, %v1863_v38, %v1864_v37 }
  0xbd   : > { %v2341_v15 = vpop.permute.xlu1 %1821 }
  0xbe   : > { %v2343_v16 = vpop.permute.xlu0 %1811 }
  0xbf   : > { %v2345_v17 = vpop.permute.xlu2 %1876 }
  0xc0   : > { %v1879_v33 = vunpack.i.h.bf16 %v2345_v17  ;;  %v1878_v34 = vunpack.i.l.bf16 %v2345_v17 }
  0xc2   : > { %v445_v43 = vsel %vm442_vm3, %v1878_v34, %v1879_v33 }
  0xc5   : > { %v2347_v18 = vpop.permute.xlu1 %1841 }
  0xc6   : > { %v2349_v19 = vpop.permute.xlu0 %1836  ;;  %v1844_v45 = vunpack.i.h.bf16 %v2347_v18 }
  0xc7   : > { %v2351_v20 = vpop.permute.xlu2 %1891 }
  0xc8   : > { %v1894_v29 = vunpack.i.h.bf16 %v2351_v20  ;;  %v1893_v30 = vunpack.i.l.bf16 %v2351_v20  ;;  %v368_v14 = vsel %vm366_vm5, %v1844_v45, %v1848_v41 }
  0xca   : > { %v482_v39 = vsel %vm479_vm2, %v1893_v30, %v1894_v29 }
  0xcd   : > { %v2353_v21 = vpop.permute.xlu1 %1856 }
  0xce   : > { %v2355_v22 = vpop.permute.xlu0 %1851  ;;  %v1859_v40 = vunpack.i.h.bf16 %v2353_v21 }
  0xcf   : > { %v2357_v23 = vpop.permute.xlu2 %1906  ;;  %v1853_v48 = vunpack.i.l.bf16 %v2355_v22 }
  0xd0   : > { %v1909_v25 = vunpack.i.h.bf16 %v2357_v23  ;;  %v1908_v26 = vunpack.i.l.bf16 %v2357_v23  ;;  %v406_v17 = vsel %vm404_vm4, %v1859_v40, %v1863_v38  ;;  %v1813_v38 = vunpack.i.l.bf16 %v2343_v16 }
  0xd2   : > { %v519_v36 = vsel %vm516_vm1, %v1908_v26, %v1909_v25 }
  0xd5   : > { %v2359_v24 = vpop.permute.xlu1 %1871 }
  0xd6   : > { %v2363_v27 = vpop.permute.xlu0 %1866  ;;  %v1874_v60 = vunpack.i.h.bf16 %v2359_v24  ;;  %v1873_v61 = vunpack.i.l.bf16 %v2359_v24 }
  0xd7   : > { %v2365_v28 = vpop.permute.xlu2 %1921 }
  0xd8   : > { %v1924_v31 = vunpack.i.h.bf16 %v2365_v28  ;;  %v1923_v32 = vunpack.i.l.bf16 %v2365_v28  ;;  %v444_v20 = vsel %vm442_vm3, %v1874_v60, %v1878_v34  ;;  %v1839_v34 = vunpack.i.h.bf16 %v2349_v19 }
  0xda   : > { %v556_v35 = vsel %vm553_vm0, %v1923_v32, %v1924_v31 }
  0xdb   : > { %677 = vmatpush.msra.mxu3 %v556_v35  ;;  %v1829_v35 = vunpack.i.h.bf16 %v2329_v9 }
  0xdd   : > { %678 = vmatpush.msra.mxu3 %v519_v36  ;;  %v1887_v42 = vpop.permute.xlu1 %1886 }
  0xde   : > { %v2387_v44 = vpop.permute.xlu0 %1881  ;;  %v1889_v63 = vunpack.i.h.bf16 %v1887_v42  ;;  %v1888_v1 = vunpack.i.l.bf16 %v1887_v42 }
  0xdf   : > { %679 = vmatpush.msra.mxu3 %v482_v39  ;;  %v1884_v36 = vunpack.i.h.bf16 %v2387_v44  ;;  %v1883_v37 = vunpack.i.l.bf16 %v2387_v44 }
  0xe0   : > { %v480_v42 = vsel %vm479_vm2, %v1888_v1, %v1889_v63  ;;  %v481_v23 = vsel %vm479_vm2, %v1889_v63, %v1893_v30  ;;  %v1828_v30 = vunpack.i.l.bf16 %v2329_v9  ;;  %v1823_v9 = vunpack.i.l.bf16 %v2341_v15 }
  0xe1   : > { %680 = vmatpush.msra.mxu3 %v445_v43  ;;  %v1868_v43 = vunpack.i.l.bf16 %v2363_v27  ;;  %v2114_v63 = vmov 41   ;;  %v2115_v1 = vmov 12  }
  0xe3   : > { %681 = vmatpush.msra.mxu3 %v407_v47  ;;  %v443_v47 = vsel %vm442_vm3, %v1873_v61, %v1874_v60  ;;  %v2111_v60 = vmov 2   ;;  %v2112_v61 = vmov 10  }
  0xe5   : > { %682 = vmatpush.msra.mxu3 %v369_v49  ;;  %v1902_v54 = vpop.permute.xlu1 %1901  ;;  %v460_v49 = vsel %vm366_vm5, %v1883_v37, %v1884_v36  ;;  %v2128_v36 = vmov 21   ;;  %v2129_v37 = vmov 28  }
  0xe6   : > { %v1897_v56 = vpop.permute.xlu0 %1896  ;;  %v1904_v58 = vunpack.i.h.bf16 %v1902_v54  ;;  %v1903_v59 = vunpack.i.l.bf16 %v1902_v54 }
  0xe7   : > { %683 = vmatpush.msra.mxu3 %v331_v51  ;;  %v1899_v8 = vunpack.i.h.bf16 %v1897_v56  ;;  %v1898_v25 = vunpack.i.l.bf16 %v1897_v56  ;;  %v1824_v51 = vunpack.i.h.bf16 %v2341_v15  ;;  %v1814_v15 = vunpack.i.h.bf16 %v2343_v16 }
  0xe8   : > { %v517_v33 = vsel %vm516_vm1, %v1903_v59, %v1904_v58  ;;  %v518_v24 = vsel %vm516_vm1, %v1904_v58, %v1908_v26  ;;  %v1869_v26 = vunpack.i.h.bf16 %v2363_v27  ;;  %v1854_v27 = vunpack.i.h.bf16 %v2355_v22 }
  0xe9   : > { %684 = vmatpush.msra.mxu3 %v294_v55  ;;  %v497_v44 = vsel %vm404_vm4, %v1898_v25, %v1899_v8  ;;  %v1838_v22 = vunpack.i.l.bf16 %v2349_v19  ;;  %v329_v19 = vsel %vm309_vm6, %v1828_v30, %v1829_v35  ;;  %v330_v55 = vsel %vm309_vm6, %v1829_v35, %v1833_v46 }
  0xea   : > { %v423_v52 = vsel %vm422_vm9, %v1868_v43, %v1869_v26  ;;  %v385_v54 = vsel %vm384_vm10, %v1853_v48, %v1854_v27  ;;  %v1809_v56 = vunpack.i.h.bf16 %v2337_v13  ;;  %v310_v41 = vsel %vm309_vm6, %v1823_v9, %v1824_v51 }
  0xeb   : > { %685 = vmatpush.msra.mxu3 %v2306_v0  ;;  %v347_v58 = vsel %vm346_vm11, %v1838_v22, %v1839_v34  ;;  %v292_v16 = vsel %vm272_vm7, %v1813_v38, %v1814_v15  ;;  %v293_v10 = vsel %vm272_vm7, %v1814_v15, %v1818_v50  ;;  %v2108_v13 = vmov 4  }
  0xec   : > { %1691 = vmatmul.msk.f32.vlgmr.msra.gmra.mxu3 %vm606_vm8, %v2411_v57  ;;  %v273_v46 = vsel %vm272_vm7, %v1808_v11, %v1809_v56  ;;  %1930 = vset.pattern.permute.xlu0 %v2108_v13  ;;  %v2119_v8 = vmov 11   ;;  %v2120_v25 = vmov 40   ;;  %v2127_v35 = vmov 26  }
  0xed   : > { %v1917_v62 = vpop.permute.xlu1 %1916  ;;  %v2134_v26 = vmov 29   ;;  %v2138_v9 = vmov 45   ;;  %vm1224_vm1 = vcmask 523264  }
  0xee   : > { %v1919_v3 = vunpack.i.h.bf16 %v1917_v62  ;;  %v1918_v4 = vunpack.i.l.bf16 %v1917_v62  ;;  %v1912_v7 = vpop.permute.xlu0 %1911  ;;  %v2113_v62 = vmov 5  }
  0xef   : > { %v1914_v28 = vunpack.i.h.bf16 %v1912_v7  ;;  %v1913_v29 = vunpack.i.l.bf16 %v1912_v7  ;;  %v2118_v7 = vmov 16  }
  0xf0   : > { %v554_v0 = vsel %vm553_vm0, %v1918_v4, %v1919_v3  ;;  %v555_v31 = vsel %vm553_vm0, %v1919_v3, %v1923_v32  ;;  %v1858_v32 = vunpack.i.l.bf16 %v2353_v21  ;;  %v1843_v21 = vunpack.i.l.bf16 %v2347_v18 }
  0xf1   : > { %v534_v39 = vsel %vm442_vm3, %v1913_v29, %v1914_v28  ;;  %637 = vmatpush.msra.mxu1 %v554_v0  ;;  %657 = vmatpush.msra.mxu2 %v555_v31  ;;  %v2116_v3 = vmov 9   ;;  %v2117_v4 = vmov 34   ;;  %v2121_v28 = vmov 18  }
  0xf2   : > { %617 = vmatpush.msra.mxu0 %v534_v39  ;;  %v405_v18 = vsel %vm404_vm4, %v1858_v32, %v1859_v40  ;;  %v367_v53 = vsel %vm366_vm5, %v1843_v21, %v1844_v45  ;;  %v2122_v29 = vmov 13   ;;  %v2123_v0 = vmov 20  }
  0xf3   : > { %638 = vmatpush.msra.mxu1 %v517_v33  ;;  %658 = vmatpush.msra.mxu2 %v518_v24  ;;  %v2124_v31 = vmov 17   ;;  %v2125_v33 = vmov 24   ;;  %v2126_v24 = vmov 19   ;;  %v2130_v39 = vmov 25  }
  0xf4   : > { %618 = vmatpush.msra.mxu0 %v497_v44  ;;  %v2131_v32 = vmov 32   ;;  %v2135_v21 = vmov 37   ;;  %vm1129_vm0 = vcmask 637952   ;;  %vm1319_vm4 = vcmask 490496  }
  0xf5   : > { %639 = vmatpush.msra.mxu1 %v480_v42  ;;  %659 = vmatpush.msra.mxu2 %v481_v23  ;;  %v2132_v42 = vmov 27   ;;  %v2133_v23 = vmov 35   ;;  %vm1558_vm5 = vcmask 1040384  }
  0xf6   : > { %619 = vmatpush.msra.mxu0 %v460_v49  ;;  %v2483_v50 = vpop.permute.xlu0 %603 }
  0xf7   : > { %640 = vmatpush.msra.mxu1 %v443_v47  ;;  %660 = vmatpush.msra.mxu2 %v444_v20  ;;  %v2136_v47 = vmov 33  }
  0xf8   : > { %620 = vmatpush.msra.mxu0 %v423_v52 }
  0xf9   : > { %641 = vmatpush.msra.mxu1 %v405_v18  ;;  %661 = vmatpush.msra.mxu2 %v406_v17 }
  0xfa   : > { %621 = vmatpush.msra.mxu0 %v385_v54 }
  0xfb   : > { %642 = vmatpush.msra.mxu1 %v367_v53  ;;  %662 = vmatpush.msra.mxu2 %v368_v14 }
  0xfc   : > { %622 = vmatpush.msra.mxu0 %v347_v58 }
  0xfd   : > { %643 = vmatpush.msra.mxu1 %v329_v19  ;;  %663 = vmatpush.msra.mxu2 %v330_v55 }
  0xfe   : > { %623 = vmatpush.msra.mxu0 %v310_v41 }
  0xff   : > { %644 = vmatpush.msra.mxu1 %v292_v16  ;;  %664 = vmatpush.msra.mxu2 %v293_v10 }
 0x100   : > { %624 = vmatpush.msra.mxu0 %v273_v46 }
 0x101   : > { %645 = vmatpush.msra.mxu1 %v2311_v5  ;;  %665 = vmatpush.msra.mxu2 %v2313_v6 }
 0x102   : > { %625 = vmatpush.msra.mxu0 %v2308_v2  ;;  %1689 = vmatmul.msk.f32.vlgmr.msra.gmra.mxu1 %vm606_vm8, %v2411_v57  ;;  %v2109_v2 = vmov 8  }
 0x103   : > { %1688 = vmatmul.msk.f32.vlgmr.msra.gmra.mxu0 %vm606_vm8, %v2411_v57  ;;  %1690 = vmatmul.msk.f32.vlgmr.msra.gmra.mxu2 %vm606_vm8, %v2411_v57  ;;  %v2110_v57 = vmov 3  }
 0x16f   : > { %v687_v27 = vpop.f32.mrf.mxu3 }
 0x170   : > { %v688_v17 = vadd.f32 %v687_v27, %v2483_v50 }
 0x172   : > { %v2532_v52 = vmax.f32 %v688_v17, 0.0 }
 0x17f   : > { %v647_v44 = vpop.f32.mrf.mxu1 }
 0x180   : > { %v627_v5 = vpop.f32.mrf.mxu0  ;;  %v648_v45 = vadd.f32 %v647_v44, %v2483_v50 }
 0x181   : > { %v628_v6 = vadd.f32 %v627_v5, %v2483_v50 }
 0x182   : > { %v2524_v30 = vmax.f32 %v648_v45, 0.0 }
 0x183   : > { %v2486_v59 = vmax.f32 %v628_v6, 0.0 }
 0x185   : > { %734 = vperm.xlu0 %1930, %v2486_v59   ;;  %704 = vperm.xlu2 %1927, %v2486_v59  }
 0x186   : > { %696 = vperm.xlu1 %1926, %v2486_v59   ;;  %v667_v51 = vpop.f32.mrf.mxu2 }
 0x187   : > { %v668_v34 = vadd.f32 %v667_v51, %v2483_v50 }
 0x189   : > { %v2534_v53 = vmax.f32 %v668_v34, 0.0 }
 0x18d   : > { %1932 = vset.pattern.permute.xlu0 %v2109_v2  ;;  %1929 = vset.pattern.permute.xlu2 %v2110_v57 }
 0x18e   : > { %1928 = vset.pattern.permute.xlu1 %v2111_v60  ;;  %781 = vperm.xlu0 %1932, %v2486_v59  }
 0x18f   : > { %724 = vperm.xlu2 %1929, %v2486_v59   ;;  %714 = vperm.xlu1 %1928, %v2486_v59  }
 0x196   : > { %1934 = vset.pattern.permute.xlu0 %v2112_v61 }
 0x197   : > { %1931 = vset.pattern.permute.xlu2 %v2113_v62  ;;  %1953 = vset.pattern.permute.xlu1 %v2114_v63 }
 0x198   : > { %830 = vperm.xlu0 %1934, %v2486_v59   ;;  %757 = vperm.xlu2 %1931, %v2486_v59  }
 0x199   : > { %1376 = vperm.xlu1 %1953, %v2486_v59  }
 0x1a0   : > { %1936 = vset.pattern.permute.xlu0 %v2115_v1  ;;  %1933 = vset.pattern.permute.xlu2 %v2116_v3 }
 0x1a1   : > { %1955 = vset.pattern.permute.xlu1 %v2117_v4  ;;  %876 = vperm.xlu0 %1936, %v2486_v59  }
 0x1a2   : > { %806 = vperm.xlu2 %1933, %v2486_v59   ;;  %1256 = vperm.xlu1 %1955, %v2486_v59  }
 0x1a9   : > { %1938 = vset.pattern.permute.xlu0 %v2118_v7 }
 0x1aa   : > { %1935 = vset.pattern.permute.xlu2 %v2119_v8  ;;  %1957 = vset.pattern.permute.xlu1 %v2120_v25 }
 0x1ab   : > { %924 = vperm.xlu0 %1938, %v2486_v59   ;;  %852 = vperm.xlu2 %1935, %v2486_v59  }
 0x1ac   : > { %1351 = vperm.xlu1 %1957, %v2486_v59  }
 0x1b3   : > { %1940 = vset.pattern.permute.xlu0 %v2121_v28  ;;  %1937 = vset.pattern.permute.xlu2 %v2122_v29 }
 0x1b4   : > { %970 = vperm.xlu0 %1940, %v2486_v59   ;;  %900 = vperm.xlu2 %1937, %v2486_v59  }
 0x1bc   : > { %1942 = vset.pattern.permute.xlu0 %v2123_v0  ;;  %1939 = vset.pattern.permute.xlu2 %v2124_v31 }
 0x1bd   : > { %1018 = vperm.xlu0 %1942, %v2486_v59   ;;  %946 = vperm.xlu2 %1939, %v2486_v59  }
 0x1c5   : > { %1944 = vset.pattern.permute.xlu0 %v2125_v33  ;;  %1941 = vset.pattern.permute.xlu2 %v2126_v24 }
 0x1c6   : > { %1065 = vperm.xlu0 %1944, %v2486_v59   ;;  %994 = vperm.xlu2 %1941, %v2486_v59  }
 0x1ce   : > { %1946 = vset.pattern.permute.xlu0 %v2127_v35  ;;  %1943 = vset.pattern.permute.xlu2 %v2128_v36 }
 0x1cf   : > { %1114 = vperm.xlu0 %1946, %v2486_v59   ;;  %1041 = vperm.xlu2 %1943, %v2486_v59  }
 0x1d7   : > { %1948 = vset.pattern.permute.xlu0 %v2129_v37  ;;  %1945 = vset.pattern.permute.xlu2 %v2130_v39 }
 0x1d8   : > { %1161 = vperm.xlu0 %1948, %v2486_v59   ;;  %1090 = vperm.xlu2 %1945, %v2486_v59  }
 0x1df   : > { %v2513_v40 = vpop.permute.xlu2 %704 }
 0x1e0   : > { %1950 = vset.pattern.permute.xlu0 %v2131_v32  ;;  %1947 = vset.pattern.permute.xlu2 %v2132_v42  ;;  %v2143_v32 = vmov 43  }
 0x1e1   : > { %1209 = vperm.xlu0 %1950, %v2486_v59   ;;  %1137 = vperm.xlu2 %1947, %v2486_v59  }
 0x1e9   : > { %1952 = vset.pattern.permute.xlu0 %v2133_v23  ;;  %1949 = vset.pattern.permute.xlu2 %v2134_v26  ;;  %v2517_v43 = vpop.permute.xlu2 %724 }
 0x1ea   : > { %1280 = vperm.xlu0 %1952, %v2486_v59   ;;  %1185 = vperm.xlu2 %1949, %v2486_v59  }
 0x1f2   : > { %1956 = vset.pattern.permute.xlu0 %v2135_v21  ;;  %1951 = vset.pattern.permute.xlu2 %v2136_v47  ;;  %v758_v20 = vpop.permute.xlu2 %757 }
 0x1f3   : > { %1327 = vperm.xlu0 %1956, %v2486_v59   ;;  %1232 = vperm.xlu2 %1951, %v2486_v59   ;;  %v760_v18 = vmul.f32 %v758_v20, %v2524_v30  ;;  %v761_v55 = vmul.f32 %v758_v20, %v2534_v53  ;;  %v762_v58 = vmul.f32 %v758_v20, %v2532_v52 }
 0x1f7   : > { %v735_v48 = vpop.permute.xlu0 %734 }
 0x1f8   : > { %v737_v49 = vmul.f32 %v735_v48, %v2524_v30  ;;  %v739_v14 = vmul.f32 %v735_v48, %v2532_v52  ;;  %v738_v38 = vmul.f32 %v735_v48, %v2534_v53  ;;  %v2594_v31 = vpop.permute.xlu1 %696 }
 0x1fa   : > { %743 = vrot.lane.b32.xlu1 %v737_v49, %s2137_s7 }
 0x1fb   : > { %1954 = vset.pattern.permute.xlu2 %v2138_v9  ;;  %766 = vrot.lane.b32.xlu0 %v760_v18, %s2137_s7 }
 0x1fc   : > { %1471 = vperm.xlu2 %1954, %v2486_v59   ;;  %v807_v22 = vpop.permute.xlu2 %806  ;;  %1958 = vset.pattern.permute.xlu0 %v2143_v32  ;;  %v709_v32 = vmul.f32 %v2513_v40, %v2532_v52 }
 0x1fd   : > { %v809_v15 = vmul.f32 %v807_v22, %v2524_v30  ;;  %v811_v6 = vmul.f32 %v807_v22, %v2532_v52  ;;  %v810_v57 = vmul.f32 %v807_v22, %v2534_v53 }
 0x200   : > { %v782_v54 = vpop.permute.xlu0 %781 }
 0x201   : > { %v784_v16 = vmul.f32 %v782_v54, %v2524_v30  ;;  %v785_v46 = vmul.f32 %v782_v54, %v2534_v53  ;;  %v786_v50 = vmul.f32 %v782_v54, %v2532_v52  ;;  %v2609_v39 = vpop.permute.xlu1 %714 }
 0x202   : > { %747 = vrot.lane.b32.xlu1 %v739_v14, %s2137_s7 }
 0x203   : > { %815 = vrot.lane.b32.xlu0 %v809_v15, %s2139_s20 }
 0x204   : > { %745 = vrot.lane.b32.xlu2 %v738_v38, %s2137_s7 }
 0x205   : > { %v853_v19 = vpop.permute.xlu2 %852 }
 0x206   : > { %v855_v56 = vmul.f32 %v853_v19, %v2524_v30  ;;  %v857_v4 = vmul.f32 %v853_v19, %v2532_v52  ;;  %v856_v33 = vmul.f32 %v853_v19, %v2534_v53 }
 0x20a   : > { %v831_v11 = vpop.permute.xlu0 %830  ;;  %768 = vrot.lane.b32.xlu1 %v761_v55, %s2137_s7 }
 0x20b   : > { %861 = vrot.lane.b32.xlu0 %v855_v56, %s2101_s9  ;;  %v834_v62 = vmul.f32 %v831_v11, %v2534_v53  ;;  %v833_v1 = vmul.f32 %v831_v11, %v2524_v30  ;;  %v835_v25 = vmul.f32 %v831_v11, %v2532_v52  ;;  %v2624_v47 = vpop.permute.xlu1 %1376 }
 0x20c   : > { %770 = vrot.lane.b32.xlu2 %v762_v58, %s2137_s7 }
 0x20e   : > { %v2544_v41 = vpop.permute.xlu2 %900 }
 0x20f   : > { %v903_v10 = vmul.f32 %v2544_v41, %v2524_v30  ;;  %v905_v35 = vmul.f32 %v2544_v41, %v2532_v52  ;;  %v904_v51 = vmul.f32 %v2544_v41, %v2534_v53 }
 0x212   : > { %790 = vrot.lane.b32.xlu1 %v784_v16, %s2139_s20 }
 0x213   : > { %909 = vrot.lane.b32.xlu0 %v903_v10, %s2101_s9  ;;  %v877_v12 = vpop.permute.xlu0 %876 }
 0x214   : > { %792 = vrot.lane.b32.xlu2 %v785_v46, %s2139_s20  ;;  %v880_v28 = vmul.f32 %v877_v12, %v2534_v53  ;;  %v879_v42 = vmul.f32 %v877_v12, %v2524_v30  ;;  %v881_v21 = vmul.f32 %v877_v12, %v2532_v52  ;;  %v2642_v17 = vpop.permute.xlu1 %1256 }
 0x215   : > { %v1260_v34 = vmul.f32 %v2642_v17, %v2534_v53 }
 0x217   : > { %v2553_v13 = vpop.permute.xlu2 %946 }
 0x218   : > { %v949_v5 = vmul.f32 %v2553_v13, %v2524_v30  ;;  %v951_v20 = vmul.f32 %v2553_v13, %v2532_v52  ;;  %v950_v16 = vmul.f32 %v2553_v13, %v2534_v53 }
 0x21a   : > { %794 = vrot.lane.b32.xlu1 %v786_v50, %s2139_s20 }
 0x21b   : > { %955 = vrot.lane.b32.xlu0 %v949_v5, %s2103_s14 }
 0x21c   : > { %819 = vrot.lane.b32.xlu2 %v811_v6, %s2139_s20 }
 0x21d   : > { %v2562_v2 = vpop.permute.xlu0 %924 }
 0x21e   : > { %v928_v23 = vmul.f32 %v2562_v2, %v2534_v53  ;;  %v927_v54 = vmul.f32 %v2562_v2, %v2524_v30  ;;  %v929_v19 = vmul.f32 %v2562_v2, %v2532_v52  ;;  %v2666_v11 = vpop.permute.xlu1 %1351 }
 0x220   : > { %v2565_v60 = vpop.permute.xlu2 %994 }
 0x221   : > { %v997_v61 = vmul.f32 %v2565_v60, %v2524_v30  ;;  %v999_v15 = vmul.f32 %v2565_v60, %v2532_v52 }
 0x222   : > { %817 = vrot.lane.b32.xlu1 %v810_v57, %s2139_s20 }
 0x223   : > { %1003 = vrot.lane.b32.xlu0 %v997_v61, %s2103_s14  ;;  %v1356_v61 = vmul.f32 %v2666_v11, %v2532_v52 }
 0x224   : > { %841 = vrot.lane.b32.xlu2 %v834_v62, %s2101_s9 }
 0x226   : > { %v2573_v63 = vpop.permute.xlu0 %970 }
 0x227   : > { %v974_v18 = vmul.f32 %v2573_v63, %v2534_v53 }
 0x229   : > { %v2576_v3 = vpop.permute.xlu2 %1041 }
 0x22a   : > { %v1044_v7 = vmul.f32 %v2576_v3, %v2524_v30  ;;  %839 = vrot.lane.b32.xlu1 %v833_v1, %s2101_s9  ;;  %v1046_v10 = vmul.f32 %v2576_v3, %v2532_v52  ;;  %v975_v1 = vmul.f32 %v2573_v63, %v2532_v52 }
 0x22c   : > { %865 = vrot.lane.b32.xlu2 %v857_v4, %s2101_s9  ;;  %1050 = vrot.lane.b32.xlu0 %v1044_v7, %s2140_s25 }
 0x22f   : > { %v2584_v8 = vpop.permute.xlu0 %1018 }
 0x230   : > { %v1022_v56 = vmul.f32 %v2584_v8, %v2534_v53 }
 0x232   : > { %v2588_v29 = vpop.permute.xlu2 %1090  ;;  %843 = vrot.lane.b32.xlu1 %v835_v25, %s2101_s9 }
 0x233   : > { %v1093_v0 = vmul.f32 %v2588_v29, %v2524_v30  ;;  %v1095_v4 = vmul.f32 %v2588_v29, %v2532_v52 }
 0x234   : > { %887 = vrot.lane.b32.xlu2 %v880_v28, %s2101_s9 }
 0x235   : > { %1099 = vrot.lane.b32.xlu0 %v1093_v0, %s2141_s30 }
 0x238   : > { %v2598_v24 = vpop.permute.xlu0 %1065 }
 0x239   : > { %v1069_v6 = vmul.f32 %v2598_v24, %v2534_v53 }
 0x23a   : > { %863 = vrot.lane.b32.xlu1 %v856_v33, %s2101_s9 }
 0x23b   : > { %v2603_v36 = vpop.permute.xlu2 %1137 }
 0x23c   : > { %v1140_v37 = vmul.f32 %v2603_v36, %v2524_v30  ;;  %913 = vrot.lane.b32.xlu2 %v905_v35, %s2101_s9  ;;  %v998_v35 = vmul.f32 %v2565_v60, %v2534_v53 }
 0x23e   : > { %1146 = vrot.lane.b32.xlu0 %v1140_v37, %s2142_s5 }
 0x241   : > { %v2615_v26 = vpop.permute.xlu0 %1114 }
 0x242   : > { %885 = vrot.lane.b32.xlu1 %v879_v42, %s2101_s9  ;;  %v1118_v37 = vmul.f32 %v2615_v26, %v2534_v53 }
 0x244   : > { %935 = vrot.lane.b32.xlu2 %v928_v23, %s2103_s14  ;;  %v2618_v44 = vpop.permute.xlu2 %1185 }
 0x245   : > { %v1188_v45 = vmul.f32 %v2618_v44, %v2524_v30 }
 0x247   : > { %1194 = vrot.lane.b32.xlu0 %v1188_v45, %s2142_s5 }
 0x24a   : > { %889 = vrot.lane.b32.xlu1 %v881_v21, %s2101_s9  ;;  %v2630_v27 = vpop.permute.xlu0 %1161 }
 0x24c   : > { %959 = vrot.lane.b32.xlu2 %v951_v20, %s2103_s14  ;;  %v1021_v20 = vmul.f32 %v2584_v8, %v2524_v30 }
 0x24d   : > { %v2632_v48 = vpop.permute.xlu2 %1232 }
 0x24e   : > { %v1237_v49 = vmul.f32 %v2632_v48, %v2532_v52 }
 0x250   : > { %1245 = vrot.lane.b32.xlu0 %v1237_v49, %s2144_s6 }
 0x252   : > { %911 = vrot.lane.b32.xlu1 %v904_v51, %s2101_s9  ;;  %s2145_s9 = smov 46   ;;  %v1142_v51 = vmul.f32 %v2603_v36, %v2532_v52 }
 0x253   : > { %v2649_v14 = vpop.permute.xlu0 %1209 }
 0x254   : > { %981 = vrot.lane.b32.xlu2 %v974_v18, %s2103_s14 }
 0x256   : > { %v2647_v22 = vpop.permute.xlu2 %1471 }
 0x257   : > { %v1474_v58 = vmul.f32 %v2647_v22, %v2524_v30 }
 0x258   : > { %1267 = vrot.lane.b32.xlu0 %v1260_v34, %s2144_s6 }
 0x25a   : > { %933 = vrot.lane.b32.xlu1 %v927_v54, %s2103_s14 }
 0x25c   : > { %1007 = vrot.lane.b32.xlu2 %v999_v15, %s2103_s14  ;;  %v2661_v55 = vpop.permute.xlu0 %1280  ;;  %v1023_v15 = vmul.f32 %v2584_v8, %v2532_v52 }
 0x25e   : > { %v746_v38 = vpop.permute.xlu2 %745 }
 0x260   : > { %1423 = vperm.xlu0 %1958, %v2486_v59  }
 0x262   : > { %937 = vrot.lane.b32.xlu1 %v929_v19, %s2103_s14  ;;  %v729_v19 = vmul.f32 %v2517_v43, %v2532_v52 }
 0x264   : > { %1029 = vrot.lane.b32.xlu2 %v1022_v56, %s2140_s25 }
 0x265   : > { %v2678_v46 = vpop.permute.xlu0 %1327 }
 0x266   : > { %v771_v41 = vpop.permute.xlu2 %770  ;;  %v1331_v13 = vmul.f32 %v2678_v46, %v2534_v53 }
 0x267   : > { %v779_v23 = vadd.f32 %v771_v41, %v709_v32 }
 0x268   : > { %1480 = vrot.lane.b32.xlu0 %v1474_v58, %s2145_s9 }
 0x269   : > { %1962 = vset.pattern.permute.xlu0 %v2138_v9  ;;  %v973_v9 = vmul.f32 %v2573_v63, %v2524_v30  ;;  %v1354_v63 = vmul.f32 %v2666_v11, %v2524_v30 }
 0x26a   : > { %957 = vrot.lane.b32.xlu1 %v950_v16, %s2103_s14 }
 0x26c   : > { %1054 = vrot.lane.b32.xlu2 %v1046_v10, %s2140_s25  ;;  %v744_v12 = vpop.permute.xlu1 %743 }
 0x26d   : > { %v750_v50 = vsel %vm749_vm12, %v744_v12, %v746_v38  ;;  %v767_v7 = vpop.permute.xlu0 %766 }
 0x26e   : > { %v793_v5 = vpop.permute.xlu2 %792 }
 0x270   : > { %1338 = vrot.lane.b32.xlu0 %v1331_v13, %s2146_s11  ;;  %v1045_v13 = vmul.f32 %v2576_v3, %v2534_v53  ;;  %v1068_v3 = vmul.f32 %v2598_v24, %v2524_v30 }
 0x272   : > { %979 = vrot.lane.b32.xlu1 %v973_v9, %s2103_s14  ;;  %v1190_v9 = vmul.f32 %v2618_v44, %v2532_v52 }
 0x274   : > { %1076 = vrot.lane.b32.xlu2 %v1069_v6, %s2141_s30  ;;  %v748_v2 = vpop.permute.xlu1 %747 }
 0x275   : > { %v751_v57 = vsel %vm749_vm12, %v746_v38, %v748_v2  ;;  %v816_v49 = vpop.permute.xlu0 %815  ;;  %v1165_v38 = vmul.f32 %v2630_v27, %v2534_v53 }
 0x276   : > { %v820_v62 = vpop.permute.xlu2 %819 }
 0x278   : > { %1364 = vrot.lane.b32.xlu0 %v1356_v61, %s2147_s13 }
 0x27a   : > { %983 = vrot.lane.b32.xlu1 %v975_v1, %s2103_s14 }
 0x27c   : > { %1103 = vrot.lane.b32.xlu2 %v1095_v4, %s2141_s30  ;;  %v769_v25 = vpop.permute.xlu1 %768 }
 0x27d   : > { %v2702_v28 = vsel %vm749_vm12, %v767_v7, %v769_v25  ;;  %v2705_v0 = vsel %vm749_vm12, %v769_v25, %v771_v41  ;;  %v862_v56 = vpop.permute.xlu0 %861  ;;  %v828_v41 = vadd.f32 %v820_v62, %v729_v19  ;;  %v700_v7 = vmul.f32 %v2594_v31, %v2534_v53 }
 0x27e   : > { %v842_v33 = vpop.permute.xlu2 %841 }
 0x27f   : > { %v755_v25 = vadd.f32 %v751_v57, %v700_v7  ;;  %v1236_v57 = vmul.f32 %v2632_v48, %v2534_v53 }
 0x280   : > { %1360 = vrot.lane.b32.xlu0 %v1354_v63, %s2147_s13 }
 0x282   : > { %1005 = vrot.lane.b32.xlu1 %v998_v35, %s2103_s14 }
 0x284   : > { %1125 = vrot.lane.b32.xlu2 %v1118_v37, %s2142_s5  ;;  %v791_v42 = vpop.permute.xlu1 %790 }
 0x285   : > { %v2719_v45 = vsel %vm796_vm13, %v791_v42, %v793_v5  ;;  %v2760_v61 = vpop.permute.xlu0 %909 }
 0x286   : > { %v866_v21 = vpop.permute.xlu2 %865 }
 0x287   : > { %v874_v60 = vadd.f32 %v866_v21, %v779_v23 }
 0x28a   : > { %1027 = vrot.lane.b32.xlu1 %v1021_v20, %s2140_s25  ;;  %v707_v20 = vmul.f32 %v2513_v40, %v2524_v30 }
 0x28c   : > { %1150 = vrot.lane.b32.xlu2 %v1142_v51, %s2142_s5  ;;  %v2727_v18 = vpop.permute.xlu1 %794 }
 0x28d   : > { %v2731_v34 = vsel %vm796_vm13, %v793_v5, %v2727_v18  ;;  %v699_v5 = vmul.f32 %v2594_v31, %v2524_v30  ;;  %v2780_v42 = vpop.permute.xlu0 %955  ;;  %v1070_v31 = vmul.f32 %v2598_v24, %v2532_v52 }
 0x28e   : > { %v2733_v54 = vpop.permute.xlu2 %887 }
 0x28f   : > { %v754_v6 = vadd.f32 %v750_v50, %v699_v5  ;;  %v1213_v50 = vmul.f32 %v2649_v14, %v2534_v53 }
 0x292   : > { %1031 = vrot.lane.b32.xlu1 %v1023_v15, %s2140_s25 }
 0x294   : > { %1172 = vrot.lane.b32.xlu2 %v1165_v38, %s2142_s5  ;;  %v818_v58 = vpop.permute.xlu1 %817 }
 0x295   : > { %v2744_v16 = vsel %vm796_vm13, %v816_v49, %v818_v58  ;;  %v2747_v10 = vsel %vm796_vm13, %v818_v58, %v820_v62  ;;  %v777_v49 = vadd.f32 %v2702_v28, %v707_v20  ;;  %v1259_v28 = vmul.f32 %v2642_v17, %v2524_v30 }
 0x296   : > { %v2749_v8 = vpop.permute.xlu2 %913 }
 0x297   : > { %v922_v12 = vadd.f32 %v2749_v8, %v828_v41  ;;  %v2807_v41 = vpop.permute.xlu0 %1003 }
 0x29a   : > { %1052 = vrot.lane.b32.xlu1 %v1045_v13, %s2140_s25 }
 0x29c   : > { %1198 = vrot.lane.b32.xlu2 %v1190_v9, %s2142_s5  ;;  %v840_v2 = vpop.permute.xlu1 %839 }
 0x29d   : > { %v845_v62 = vsel %vm442_vm3, %v840_v2, %v842_v33  ;;  %v719_v2 = vmul.f32 %v2609_v39, %v2532_v52 }
 0x29e   : > { %v2763_v1 = vpop.permute.xlu2 %935  ;;  %v2765_v4 = vadd.f32 %v845_v62, %v754_v6  ;;  %v1117_v6 = vmul.f32 %v2615_v26, %v2524_v30  ;;  %v718_v62 = vmul.f32 %v2609_v39, %v2534_v53 }
 0x29f   : > { %v2835_v7 = vpop.permute.xlu0 %1050 }
 0x2a2   : > { %1074 = vrot.lane.b32.xlu1 %v1068_v3, %s2141_s30  ;;  %v804_v3 = vadd.f32 %v2727_v18, %v719_v2  ;;  %v1283_v18 = vmul.f32 %v2661_v55, %v2524_v30  ;;  %v1166_v2 = vmul.f32 %v2630_v27, %v2532_v52 }
 0x2a4   : > { %1220 = vrot.lane.b32.xlu2 %v1213_v50, %s2144_s6  ;;  %v844_v63 = vpop.permute.xlu1 %843 }
 0x2a5   : > { %v846_v35 = vsel %vm442_vm3, %v842_v33, %v844_v63  ;;  %v708_v33 = vmul.f32 %v2513_v40, %v2534_v53  ;;  %v1094_v40 = vmul.f32 %v2588_v29, %v2534_v53 }
 0x2a6   : > { %v2776_v37 = vpop.permute.xlu2 %959  ;;  %v2778_v32 = vadd.f32 %v846_v35, %v755_v25 }
 0x2a7   : > { %v2783_v23 = vadd.f32 %v2776_v37, %v874_v60  ;;  %v778_v51 = vadd.f32 %v2705_v0, %v708_v33  ;;  %v717_v0 = vmul.f32 %v2609_v39, %v2524_v30  ;;  %v1119_v39 = vmul.f32 %v2615_v26, %v2532_v52 }
 0x2aa   : > { %1078 = vrot.lane.b32.xlu1 %v1070_v31, %s2141_s30 }
 0x2ac   : > { %1243 = vrot.lane.b32.xlu2 %v1236_v57, %s2144_s6  ;;  %v864_v60 = vpop.permute.xlu1 %863  ;;  %v728_v57 = vmul.f32 %v2517_v43, %v2534_v53 }
 0x2ad   : > { %v867_v24 = vsel %vm442_vm3, %v862_v56, %v864_v60  ;;  %v868_v15 = vsel %vm442_vm3, %v864_v60, %v866_v21  ;;  %v802_v21 = vadd.f32 %v2719_v45, %v717_v0  ;;  %v1285_v45 = vmul.f32 %v2661_v55, %v2532_v52 }
 0x2ae   : > { %v2799_v38 = vpop.permute.xlu2 %981  ;;  %v2801_v19 = vadd.f32 %v867_v24, %v777_v49  ;;  %v2803_v58 = vadd.f32 %v868_v15, %v778_v51  ;;  %v827_v33 = vadd.f32 %v2747_v10, %v728_v57  ;;  %v2859_v49 = vpop.permute.xlu0 %1099  ;;  %v1381_v10 = vmul.f32 %v2624_v47, %v2532_v52 }
 0x2b2   : > { %1101 = vrot.lane.b32.xlu1 %v1094_v40, %s2141_s30 }
 0x2b4   : > { %1265 = vrot.lane.b32.xlu2 %v1259_v28, %s2144_s6  ;;  %v886_v56 = vpop.permute.xlu1 %885 }
 0x2b5   : > { %v891_v13 = vsel %vm442_vm3, %v886_v56, %v2733_v54 }
 0x2b6   : > { %v2818_v5 = vpop.permute.xlu2 %1007  ;;  %v2820_v29 = vadd.f32 %v891_v13, %v802_v21  ;;  %v2880_v0 = vpop.permute.xlu0 %1146  ;;  %v1379_v21 = vmul.f32 %v2624_v47, %v2524_v30 }
 0x2b7   : > { %v2823_v9 = vadd.f32 %v2818_v5, %v922_v12  ;;  %v803_v12 = vadd.f32 %v2731_v34, %v718_v62  ;;  %v727_v34 = vmul.f32 %v2517_v43, %v2524_v30  ;;  %v1476_v62 = vmul.f32 %v2647_v22, %v2532_v52 }
 0x2b9   : > { %v826_v20 = vadd.f32 %v2744_v16, %v727_v34  ;;  %v1141_v16 = vmul.f32 %v2603_v36, %v2534_v53  ;;  %v1164_v36 = vmul.f32 %v2630_v27, %v2524_v30 }
 0x2ba   : > { %1123 = vrot.lane.b32.xlu1 %v1117_v6, %s2142_s5 }
 0x2bc   : > { %1293 = vrot.lane.b32.xlu2 %v1285_v45, %s2144_s6  ;;  %v890_v50 = vpop.permute.xlu1 %889 }
 0x2bd   : > { %v892_v25 = vsel %vm442_vm3, %v2733_v54, %v890_v50  ;;  %v2841_v63 = vadd.f32 %v890_v50, %v804_v3  ;;  %v2148_v54 = vmov 36  }
 0x2be   : > { %v2843_v35 = vpop.permute.xlu2 %1029  ;;  %v2845_v31 = vadd.f32 %v892_v25, %v803_v12  ;;  %1960 = vset.pattern.permute.xlu2 %v2148_v54  ;;  %v2895_v45 = vpop.permute.xlu0 %1194  ;;  %v2149_v25 = vmov 44  }
 0x2bf   : > { %1959 = vset.pattern.permute.xlu1 %v2149_v25 }
 0x2c2   : > { %1127 = vrot.lane.b32.xlu1 %v1119_v39, %s2142_s5  ;;  %v1189_v39 = vmul.f32 %v2618_v44, %v2534_v53  ;;  %v1212_v44 = vmul.f32 %v2649_v14, %v2524_v30 }
 0x2c4   : > { %1289 = vrot.lane.b32.xlu2 %v1283_v18, %s2144_s6  ;;  %v912_v26 = vpop.permute.xlu1 %911 }
 0x2c5   : > { %v915_v51 = vsel %vm442_vm3, %v2760_v61, %v912_v26  ;;  %v916_v60 = vsel %vm442_vm3, %v912_v26, %v2749_v8  ;;  %vm1415_vm3 = vcmask 375808  }
 0x2c6   : > { %v2865_v43 = vpop.permute.xlu2 %1054  ;;  %v920_v24 = vadd.f32 %v915_v51, %v826_v20  ;;  %v921_v15 = vadd.f32 %v916_v60, %v827_v33  ;;  %v2912_v18 = vpop.permute.xlu0 %1245  ;;  %v1355_v20 = vmul.f32 %v2666_v11, %v2534_v53  ;;  %v1330_v11 = vmul.f32 %v2678_v46, %v2524_v30 }
 0x2ca   : > { %1148 = vrot.lane.b32.xlu1 %v1141_v16, %s2142_s5  ;;  %v1214_v16 = vmul.f32 %v2649_v14, %v2532_v52  ;;  %v1235_v14 = vmul.f32 %v2632_v48, %v2524_v30 }
 0x2cc   : > { %1389 = vrot.lane.b32.xlu2 %v1381_v10, %s2147_s13  ;;  %v934_v40 = vpop.permute.xlu1 %933 }
 0x2cd   : > { %v939_v61 = vsel %vm479_vm2, %v934_v40, %v2763_v1 }
 0x2ce   : > { %v2875_v28 = vpop.permute.xlu2 %1076  ;;  %v2878_v8 = vadd.f32 %v939_v61, %v2765_v4  ;;  %v2932_v33 = vpop.permute.xlu0 %1267 }
 0x2d2   : > { %1170 = vrot.lane.b32.xlu1 %v1164_v36, %s2142_s5 }
 0x2d4   : > { %1385 = vrot.lane.b32.xlu2 %v1379_v21, %s2147_s13  ;;  %v938_v56 = vpop.permute.xlu1 %937 }
 0x2d5   : > { %v940_v13 = vsel %vm479_vm2, %v2763_v1, %v938_v56 }
 0x2d6   : > { %v2890_v6 = vpop.permute.xlu2 %1103  ;;  %v944_v4 = vadd.f32 %v940_v13, %v2778_v32  ;;  %v2952_v36 = vpop.permute.xlu0 %1423 }
 0x2d7   : > { %v1428_v21 = vmul.f32 %v2952_v36, %v2532_v52 }
 0x2da   : > { %1174 = vrot.lane.b32.xlu1 %v1166_v2, %s2142_s5 }
 0x2dc   : > { %1484 = vrot.lane.b32.xlu2 %v1476_v62, %s2145_s9  ;;  %v958_v3 = vpop.permute.xlu1 %957 }
 0x2dd   : > { %v961_v1 = vsel %vm479_vm2, %v2780_v42, %v958_v3  ;;  %v962_v12 = vsel %vm479_vm2, %v958_v3, %v2776_v37  ;;  %v1063_v37 = vadd.f32 %v2865_v43, %v2783_v23  ;;  %v1284_v3 = vmul.f32 %v2661_v55, %v2534_v53 }
 0x2de   : > { %v2905_v32 = vpop.permute.xlu2 %1125  ;;  %v966_v27 = vadd.f32 %v961_v1, %v2801_v19  ;;  %v967_v50 = vadd.f32 %v962_v12, %v2803_v58 }
 0x2e2   : > { %1196 = vrot.lane.b32.xlu1 %v1189_v39, %s2142_s5  ;;  %s2043_s5 = scalar_lea.hbm %s3184_s4, 4 }
 0x2e4   : > { %1304 = vperm.xlu2 %1960, %v2486_v59   ;;  %v980_v42 = vpop.permute.xlu1 %979 }
 0x2e5   : > { %v985_v19 = vsel %vm479_vm2, %v980_v42, %v2799_v38 }
 0x2e6   : > { %v2919_v34 = vpop.permute.xlu2 %1150  ;;  %v990_v58 = vadd.f32 %v985_v19, %v2820_v29 }
 0x2e7   : > { %v1159_v57 = vadd.f32 %v2919_v34, %v1063_v37 }
 0x2e9   : > { %v2926_v54 = vadd.f32 %v2912_v18, %v1159_v57 }
 0x2ea   : > { %1218 = vrot.lane.b32.xlu1 %v1212_v44, %s2144_s6 }
 0x2ec   : > { %1362 = vrot.lane.b32.xlu2 %v1355_v20, %s2147_s13  ;;  %v984_v23 = vpop.permute.xlu1 %983  ;;  %v1261_v20 = vmul.f32 %v2642_v17, %v2532_v52 }
 0x2ed   : > { %v986_v29 = vsel %vm479_vm2, %v2799_v38, %v984_v23  ;;  %v992_v26 = vadd.f32 %v984_v23, %v2841_v63 }
 0x2ee   : > { %v2937_v51 = vpop.permute.xlu2 %1172  ;;  %v991_v60 = vadd.f32 %v986_v29, %v2845_v31 }
 0x2f2   : > { %1222 = vrot.lane.b32.xlu1 %v1214_v16, %s2144_s6 }
 0x2f4   : > { %1336 = vrot.lane.b32.xlu2 %v1330_v11, %s2146_s11  ;;  %v1006_v10 = vpop.permute.xlu1 %1005 }
 0x2f5   : > { %v1009_v38 = vsel %vm479_vm2, %v2807_v41, %v1006_v10  ;;  %v1010_v63 = vsel %vm479_vm2, %v1006_v10, %v2818_v5  ;;  %vm1366_vm2 = vcmask 408576  }
 0x2f6   : > { %v2950_v40 = vpop.permute.xlu2 %1198  ;;  %v1014_v31 = vadd.f32 %v1009_v38, %v920_v24  ;;  %v1015_v61 = vadd.f32 %v1010_v63, %v921_v15  ;;  %v1426_v15 = vmul.f32 %v2952_v36, %v2524_v30  ;;  %v1112_v38 = vadd.f32 %v2890_v6, %v2823_v9 }
 0x2f7   : > { %v1427_v9 = vmul.f32 %v2952_v36, %v2534_v53 }
 0x2f8   : > { %v1207_v63 = vadd.f32 %v2950_v40, %v1112_v38 }
 0x2fa   : > { %1241 = vrot.lane.b32.xlu1 %v1235_v14, %s2144_s6 }
 0x2fc   : > { %1436 = vrot.lane.b32.xlu2 %v1428_v21, %s2145_s9  ;;  %v1028_v41 = vpop.permute.xlu1 %1027 }
 0x2fd   : > { %v1034_v5 = vsel %vm1033_vm14, %v1028_v41, %v2843_v35 }
 0x2fe   : > { %v2962_v56 = vpop.permute.xlu2 %1220  ;;  %v1038_v24 = vadd.f32 %v1034_v5, %v2878_v8 }
 0x302   : > { %1447 = vperm.xlu1 %1959, %v2486_v59  }
 0x304   : > { %1432 = vrot.lane.b32.xlu2 %v1426_v15, %s2145_s9  ;;  %v1032_v48 = vpop.permute.xlu1 %1031 }
 0x305   : > { %v1035_v13 = vsel %vm1033_vm14, %v2843_v35, %v1032_v48  ;;  %v2150_v35 = vmov 42  }
 0x306   : > { %v2971_v2 = vpop.permute.xlu2 %1243  ;;  %v1039_v62 = vadd.f32 %v1035_v13, %v944_v4  ;;  %v1380_v4 = vmul.f32 %v2624_v47, %v2534_v53 }
 0x307   : > { %v1248_v36 = vsel %vm1224_vm1, %v2971_v2, %v2912_v18 }
 0x30a   : > { %1291 = vrot.lane.b32.xlu1 %v1284_v3, %s2144_s6 }
 0x30b   : > { %1961 = vset.pattern.permute.xlu1 %v2150_v35 }
 0x30c   : > { %v1053_v8 = vpop.permute.xlu1 %1052 }
 0x30d   : > { %v1056_v1 = vsel %vm1033_vm14, %v2835_v7, %v1053_v8  ;;  %v1057_v12 = vsel %vm1033_vm14, %v1053_v8, %v2865_v43  ;;  %v1475_v43 = vmul.f32 %v2647_v22, %v2534_v53 }
 0x30e   : > { %v2980_v25 = vpop.permute.xlu2 %1265  ;;  %v1061_v39 = vadd.f32 %v1056_v1, %v966_v27  ;;  %v1062_v42 = vadd.f32 %v1057_v12, %v967_v50 }
 0x312   : > { %1387 = vrot.lane.b32.xlu1 %v1380_v4, %s2147_s13 }
 0x314   : > { %v1075_v55 = vpop.permute.xlu1 %1074 }
 0x315   : > { %v1081_v37 = vsel %vm1080_vm15, %v1075_v55, %v2875_v28 }
 0x316   : > { %v2987_v7 = vpop.permute.xlu2 %1293  ;;  %v1086_v19 = vadd.f32 %v1081_v37, %v990_v58 }
 0x31a   : > { %1482 = vrot.lane.b32.xlu1 %v1475_v43, %s2145_s9 }
 0x31c   : > { %v1079_v27 = vpop.permute.xlu1 %1078 }
 0x31d   : > { %v1082_v50 = vsel %vm1080_vm15, %v2875_v28, %v1079_v27  ;;  %v1088_v47 = vadd.f32 %v1079_v27, %v992_v26  ;;  %v1332_v26 = vmul.f32 %v2678_v46, %v2532_v52  ;;  %v1302_v46 = vadd.f32 %v2987_v7, %v1207_v63 }
 0x31e   : > { %v2994_v57 = vpop.permute.xlu2 %1289  ;;  %v1087_v44 = vadd.f32 %v1082_v50, %v991_v60  ;;  %v3011_v60 = vpop.permute.xlu0 %1480 }
 0x322   : > { %1269 = vrot.lane.b32.xlu1 %v1261_v20, %s2144_s6 }
 0x324   : > { %v1102_v23 = vpop.permute.xlu1 %1101 }
 0x325   : > { %v1105_v58 = vsel %vm1080_vm15, %v2859_v49, %v1102_v23  ;;  %v1106_v22 = vsel %vm1080_vm15, %v1102_v23, %v2890_v6 }
 0x326   : > { %v3003_v29 = vpop.permute.xlu2 %1389  ;;  %v3005_v16 = vadd.f32 %v1105_v58, %v1014_v31  ;;  %v3007_v28 = vadd.f32 %v1106_v22, %v1015_v61  ;;  %v3021_v31 = vpop.permute.xlu0 %1338 }
 0x327   : > { %v1398_v14 = vadd.f32 %v3003_v29, %v1302_v46 }
 0x32a   : > { %1340 = vrot.lane.b32.xlu1 %v1332_v26, %s2146_s11 }
 0x32c   : > { %v1124_v17 = vpop.permute.xlu1 %1123 }
 0x32d   : > { %v1130_v49 = vsel %vm1129_vm0, %v1124_v17, %v2905_v32 }
 0x32e   : > { %v3016_v11 = vpop.permute.xlu2 %1385  ;;  %v1134_v10 = vadd.f32 %v1130_v49, %v1038_v24 }
 0x332   : > { %1400 = vperm.xlu1 %1961, %v2486_v59   ;;  %v3035_v59 = vpop.permute.xlu0 %1364 }
 0x334   : > { %v1128_v61 = vpop.permute.xlu1 %1127 }
 0x335   : > { %v1131_v21 = vsel %vm1129_vm0, %v2905_v32, %v1128_v61 }
 0x336   : > { %v3028_v41 = vpop.permute.xlu2 %1484  ;;  %v1135_v5 = vadd.f32 %v1131_v21, %v1039_v62 }
 0x337   : > { %v1493_v24 = vadd.f32 %v3028_v41, %v1398_v14 }
 0x339   : > { %1516 = vrot.lane.b32.xlu2 %v1493_v24, %s2095_s23 }
 0x33a   : > { %1434 = vrot.lane.b32.xlu1 %v1427_v9, %s2145_s9  ;;  %v1361_v1 = vpop.permute.xlu0 %1360 }
 0x33c   : > { %v1149_v6 = vpop.permute.xlu1 %1148 }
 0x33d   : > { %v1152_v15 = vsel %vm1129_vm0, %v2880_v0, %v1149_v6  ;;  %v1153_v32 = vsel %vm1129_vm0, %v1149_v6, %v2919_v34 }
 0x33e   : > { %v3041_v48 = vpop.permute.xlu2 %1304  ;;  %v3043_v13 = vadd.f32 %v1152_v15, %v1061_v39  ;;  %v1158_v62 = vadd.f32 %v1153_v32, %v1062_v42  ;;  %v1271_v42 = vsel %vm1224_vm1, %v2980_v25, %v2932_v33 }
 0x33f   : > { %v1309_v3 = vmul.f32 %v3041_v48, %v2532_v52 }
 0x340   : > { %v3050_v8 = vadd.f32 %v1248_v36, %v1158_v62  ;;  %v1307_v62 = vmul.f32 %v3041_v48, %v2524_v30 }
 0x341   : > { %1317 = vrot.lane.b32.xlu2 %v1309_v3, %s2146_s11 }
 0x344   : > { %v1171_v0 = vpop.permute.xlu1 %1170 }
 0x345   : > { %v1176_v34 = vsel %vm1129_vm0, %v1171_v0, %v2937_v51 }
 0x346   : > { %v1363_v12 = vpop.permute.xlu2 %1362  ;;  %v1181_v39 = vadd.f32 %v1176_v34, %v1086_v19 }
 0x347   : > { %v1367_v18 = vsel %vm1366_vm2, %v1361_v1, %v1363_v12  ;;  %v1368_v35 = vsel %vm1366_vm2, %v1363_v12, %v3035_v59 }
 0x348   : > { %v1276_v4 = vadd.f32 %v1271_v42, %v1181_v39 }
 0x34a   : > { %v3061_v55 = vadd.f32 %v1367_v18, %v1276_v4 }
 0x34c   : > { %v1175_v37 = vpop.permute.xlu1 %1174 }
 0x34d   : > { %v1177_v43 = vsel %vm1129_vm0, %v2937_v51, %v1175_v37  ;;  %v1183_v27 = vadd.f32 %v1175_v37, %v1088_v47 }
 0x34e   : > { %v1182_v50 = vadd.f32 %v1177_v43, %v1087_v44  ;;  %v1337_v3 = vpop.permute.xlu2 %1336 }
 0x354   : > { %v1197_v20 = vpop.permute.xlu1 %1196 }
 0x355   : > { %v1201_v63 = vsel %vm1129_vm0, %v1197_v20, %v2950_v40 }
 0x356   : > { %v1206_v21 = vadd.f32 %v1201_v63, %v3007_v28  ;;  %v1437_v34 = vpop.permute.xlu2 %1436 }
 0x35c   : > { %v1219_v19 = vpop.permute.xlu1 %1218 }
 0x35d   : > { %v1225_v23 = vsel %vm1224_vm1, %v1219_v19, %v2962_v56 }
 0x35e   : > { %v3067_v25 = vadd.f32 %v1225_v23, %v1134_v10 }
 0x364   : > { %v1223_v58 = vpop.permute.xlu1 %1222 }
 0x365   : > { %v1226_v22 = vsel %vm1224_vm1, %v2962_v56, %v1223_v58  ;;  %v1200_v56 = vsel %vm1129_vm0, %v2895_v45, %v1197_v20 }
 0x366   : > { %v3071_v26 = vadd.f32 %v1226_v22, %v1135_v5  ;;  %v1205_v14 = vadd.f32 %v1200_v56, %v3005_v16 }
 0x36c   : > { %v1242_v17 = vpop.permute.xlu1 %1241 }
 0x374   : > { %v1448_v49 = vpop.permute.xlu1 %1447 }
 0x375   : > { %v1451_v38 = vmul.f32 %v1448_v49, %v2534_v53  ;;  %v1452_v51 = vmul.f32 %v1448_v49, %v2532_v52  ;;  %v1450_v44 = vmul.f32 %v1448_v49, %v2524_v30 }
 0x377   : > { %1460 = vrot.lane.b32.xlu1 %v1452_v51, %s2145_s9  ;;  %1458 = vrot.lane.b32.xlu0 %v1451_v38, %s2145_s9 }
 0x37c   : > { %v1292_v47 = vpop.permute.xlu1 %1291 }
 0x37d   : > { %v1295_v46 = vsel %vm1224_vm1, %v2994_v57, %v1292_v47  ;;  %v1296_v61 = vsel %vm1224_vm1, %v1292_v47, %v2987_v7 }
 0x37e   : > { %v1300_v45 = vadd.f32 %v1295_v46, %v1205_v14  ;;  %v1301_v9 = vadd.f32 %v1296_v61, %v1206_v21 }
 0x37f   : > { %1456 = vrot.lane.b32.xlu0 %v1450_v44, %s2145_s9 }
 0x384   : > { %v1388_v10 = vpop.permute.xlu1 %1387 }
 0x385   : > { %v1391_v5 = vsel %vm1366_vm2, %v3016_v11, %v1388_v10  ;;  %v1392_v24 = vsel %vm1366_vm2, %v1388_v10, %v3003_v29 }
 0x386   : > { %v1396_v40 = vadd.f32 %v1391_v5, %v1300_v45  ;;  %v1397_v6 = vadd.f32 %v1392_v24, %v1301_v9 }
 0x38c   : > { %v1483_v15 = vpop.permute.xlu1 %1482 }
 0x38d   : > { %v1486_v57 = vsel %vm1415_vm3, %v3011_v60, %v1483_v15  ;;  %v1487_v7 = vsel %vm1415_vm3, %v1483_v15, %v3028_v41  ;;  %v1308_v60 = vmul.f32 %v3041_v48, %v2534_v53 }
 0x38e   : > { %v1491_v16 = vadd.f32 %v1486_v57, %v1396_v40  ;;  %v1492_v28 = vadd.f32 %v1487_v7, %v1397_v6 }
 0x390   : > { %1514 = vrot.lane.b32.xlu1 %v1492_v28, %s2095_s23  ;;  %1512 = vrot.lane.b32.xlu0 %v1491_v16, %s2095_s23 }
 0x394   : > { %v1270_v11 = vpop.permute.xlu1 %1269 }
 0x395   : > { %v1272_v29 = vsel %vm1224_vm1, %v2932_v33, %v1270_v11  ;;  %v1278_v32 = vadd.f32 %v1270_v11, %v1183_v27  ;;  %v1247_v33 = vsel %vm1224_vm1, %v1242_v17, %v2971_v2 }
 0x396   : > { %v1277_v36 = vadd.f32 %v1272_v29, %v1182_v50  ;;  %v1252_v48 = vadd.f32 %v1247_v33, %v3043_v13 }
 0x398   : > { %1315 = vrot.lane.b32.xlu1 %v1308_v60, %s2146_s11  ;;  %1313 = vrot.lane.b32.xlu0 %v1307_v62, %s2146_s11  ;;  %v1373_v41 = vadd.f32 %v1368_v35, %v1277_v36 }
 0x39c   : > { %v1341_v0 = vpop.permute.xlu1 %1340 }
 0x39d   : > { %v1343_v18 = vsel %vm1319_vm4, %v3021_v31, %v1341_v0  ;;  %v1349_v2 = vadd.f32 %v1341_v0, %v2926_v54  ;;  %v1374_v54 = vadd.f32 %v3035_v59, %v1278_v32 }
 0x39f   : > { %v1445_v37 = vadd.f32 %v1437_v34, %v1349_v2 }
 0x3a4   : > { %v1401_v1 = vpop.permute.xlu1 %1400 }
 0x3a5   : > { %v1403_v12 = vmul.f32 %v1401_v1, %v2524_v30  ;;  %v1404_v39 = vmul.f32 %v1401_v1, %v2534_v53  ;;  %v1405_v42 = vmul.f32 %v1401_v1, %v2532_v52  ;;  %v1342_v30 = vsel %vm1319_vm4, %v1337_v3, %v3021_v31  ;;  %v1433_v53 = vpop.permute.xlu2 %1432 }
 0x3a6   : > { %v1348_v52 = vadd.f32 %v1343_v18, %v3050_v8  ;;  %v1347_v35 = vadd.f32 %v1342_v30, %v1252_v48 }
 0x3a7   : > { %1413 = vrot.lane.b32.xlu2 %v1405_v42, %s2145_s9  ;;  %1411 = vrot.lane.b32.xlu1 %v1404_v39, %s2145_s9 }
 0x3a8   : > { %1409 = vrot.lane.b32.xlu0 %v1403_v12, %s2145_s9 }
 0x3ac   : > { %v1435_v4 = vpop.permute.xlu1 %1434 }
 0x3ad   : > { %v1438_v43 = vsel %vm1415_vm3, %v1433_v53, %v1435_v4  ;;  %v1439_v13 = vsel %vm1415_vm3, %v1435_v4, %v1437_v34  ;;  %v1517_v8 = vpop.permute.xlu2 %1516 }
 0x3ae   : > { %v1443_v27 = vadd.f32 %v1438_v43, %v1347_v35  ;;  %v1444_v50 = vadd.f32 %v1439_v13, %v1348_v52  ;;  %v1561_v35 = vlaneseq }
 0x3af   : > { %1501 = vrot.lane.b32.xlu2 %v1445_v37, %s2095_s23 }
 0x3b0   : > { %1499 = vrot.lane.b32.xlu1 %v1444_v50, %s2095_s23  ;;  %1497 = vrot.lane.b32.xlu0 %v1443_v27, %s2095_s23  ;;  %s1687_s23 = sshll.u32 %s2292_s29, 1 }
 0x3b1   : > { %s255_s22 = scalar_lea.vmem [#allocation8], %s1687_s23 }
 0x3b2   : > { %s1579_s0 = sshll.u32 %s255_s22, 4  ;;  %s1580_s0 = int_to_ptr.vmem [resolvable:$true] %s1579_s0 }
 0x3b5   : > { %v1318_v63 = vpop.permute.xlu2 %1317 }
 0x3e9   : > { %v1461_v31 = vpop.permute.xlu1 %1460  ;;  %v1459_v23 = vpop.permute.xlu0 %1458 }
 0x3ea   : > { %v1469_v20 = vadd.f32 %v1461_v31, %v1374_v54  ;;  %v1463_v22 = vsel %vm1415_vm3, %v1459_v23, %v1461_v31 }
 0x3eb   : > { %v1468_v49 = vadd.f32 %v1463_v22, %v1373_v41 }
 0x3ec   : > { %v1525_v19 = vadd.f32 %v1517_v8, %v1469_v20 }
 0x3ee   : > { %1533 = vrot.lane.b32.xlu2 %v1525_v19, %s2096_s26 }
 0x3f1   : > { %v1457_v58 = vpop.permute.xlu0 %1456 }
 0x3f2   : > { %v1462_v17 = vsel %vm1415_vm3, %v1457_v58, %v1459_v23 }
 0x3f3   : > { %v1467_v38 = vadd.f32 %v1462_v17, %v3061_v55 }
 0x401   : > { %v1414_v14 = vpop.permute.xlu2 %1413 }
 0x402   : > { %v1513_v51 = vpop.permute.xlu0 %1512  ;;  %v1515_v47 = vpop.permute.xlu1 %1514 }
 0x403   : > { %v1518_v44 = vsel %vm272_vm7, %v1513_v51, %v1515_v47  ;;  %v1519_v59 = vsel %vm272_vm7, %v1515_v47, %v1517_v8 }
 0x404   : > { %v1523_v10 = vadd.f32 %v1518_v44, %v1467_v38  ;;  %v1524_v56 = vadd.f32 %v1519_v59, %v1468_v49 }
 0x406   : > { %1531 = vrot.lane.b32.xlu1 %v1524_v56, %s2096_s26  ;;  %1529 = vrot.lane.b32.xlu0 %v1523_v10, %s2096_s26  ;;  %s1693_s26 = sshll.u32 %s2197_s19, 1  ;;  %s1567_s19 = scalar_lea.sflag [#allocation5], %s2292_s29 }
 0x407   : > { %s1577_s8 = scalar_lea.hbm %s3184_s4, %s1693_s26 }
 0x408   : > { %s1581_s12 = sshll.u32 %s1577_s8, 4  ;;  %s1582_s12 = int_to_ptr.hbm [resolvable:$true] %s1581_s12 }
 0x409   : > { %v1502_v24 = vpop.permute.xlu2 %1501  ;;  %s2037_s7 = sshra.s32 %s1582_s12, 4  ;;  %s2038_s7 = int_to_ptr.hbm [resolvable:$true] %s2037_s7 }
 0x40a   : > { %v1314_v46 = vpop.permute.xlu0 %1313  ;;  %v1316_v61 = vpop.permute.xlu1 %1315  ;;  %s2039_s20 = scalar_lea.hbm %s2038_s7, 2  ;;  %p2044_p10 = scmp.lt.s32.totalorder %s2038_s7, %s3184_s4 }
 0x40b   : > { %v1320_v9 = vsel %vm1319_vm4, %v1314_v46, %v1316_v61  ;;  %v1321_v40 = vsel %vm1319_vm4, %v1316_v61, %v1318_v63  ;;  %p2040_p6 = scmp.ne.s32.totalorder %s2038_s7, %s2039_s20  ;;  %p2045_p2 = scmp.lt.s32.totalorder %s2043_s5, %s2039_s20 }
 0x40c   : > { %v1324_v57 = vadd.f32 %v1320_v9, %v3067_v25  ;;  %v1325_v7 = vadd.f32 %v1321_v40, %v3071_v26 }
 0x40d   : > { %p2041_p13 = pnand %p2040_p6, %p2226_p11  ;;  %p2046_p9 = por %p2045_p2, %p2044_p10 }
 0x40f   : > { %p2042_p3 = pneg %p2041_p13 }
 0x411   : > { %p2047_p0 = pnand %p2046_p9, %p2042_p3 }
 0x419   : > { %v1412_v5 = vpop.permute.xlu1 %1411 }
 0x41a   : > { %v1410_v21 = vpop.permute.xlu0 %1409  ;;  %v1417_v15 = vsel %vm1415_vm3, %v1412_v5, %v1414_v14 }
 0x41b   : > { %v1416_v6 = vsel %vm1415_vm3, %v1410_v21, %v1412_v5  ;;  %v1421_v29 = vadd.f32 %v1417_v15, %v1325_v7 }
 0x41c   : > { %v1420_v11 = vadd.f32 %v1416_v6, %v1324_v57 }
 0x422   : > { %v1498_v55 = vpop.permute.xlu0 %1497  ;;  %v1500_v45 = vpop.permute.xlu1 %1499 }
 0x423   : > { %v1503_v16 = vsel %vm272_vm7, %v1498_v55, %v1500_v45  ;;  %v1504_v28 = vsel %vm272_vm7, %v1500_v45, %v1502_v24 }
 0x424   : > { %v1507_v62 = vadd.f32 %v1503_v16, %v1420_v11  ;;  %v1508_v60 = vadd.f32 %v1504_v28, %v1421_v29 }
 0x448   : > { %v1534_v32 = vpop.permute.xlu2 %1533 }
 0x478   : > { %v1530_v36 = vpop.permute.xlu0 %1529  ;;  %v1532_v3 = vpop.permute.xlu1 %1531 }
 0x479   : > { %v1535_v41 = vsel %vm309_vm6, %v1530_v36, %v1532_v3  ;;  %v1536_v0 = vsel %vm309_vm6, %v1532_v3, %v1534_v32  ;;  %vm1563_vm6 = vcmp.lt.s32.totalorder %v1561_v35, 256 }
 0x47a   : > { %v1539_v25 = vadd.f32 %v1535_v41, %v1507_v62  ;;  %v1540_v34 = vadd.f32 %v1536_v0, %v1508_v60 }
 0x47c   : > { %v1541_v26 = vrot.slane %v1539_v25, 4  ;;  %v1547_v1 = vrot.slane %v1540_v34, 4 }
 0x47e   : > { %v1542_v33 = vadd.f32 %v1541_v26, %v1539_v25  ;;  %v1548_v12 = vadd.f32 %v1547_v1, %v1540_v34 }
 0x480   : > { %v1543_v39 = vrot.slane %v1542_v33, 2  ;;  %v1549_v42 = vrot.slane %v1548_v12, 2 }
 0x482   : > { %v1544_v48 = vadd.f32 %v1543_v39, %v1542_v33  ;;  %v1550_v18 = vadd.f32 %v1549_v42, %v1548_v12 }
 0x484   : > { %v1545_v2 = vrot.slane %v1544_v48, 1  ;;  %v1551_v30 = vrot.slane %v1550_v18, 1 }
 0x486   : > { %v1546_v53 = vadd.f32 %v1545_v2, %v1544_v48  ;;  %v1552_v52 = vadd.f32 %v1551_v30, %v1550_v18 }
 0x488   : > { %v1554_v4 = vmul.f32 0.001, %v1552_v52  ;;  %v1553_v37 = vmul.f32 0.001, %v1546_v53 }
 0x48a   : > { %v1557_v43 = vrot.slane %v1554_v4, 7 }
 0x48c   : > { %v1559_v13 = vsel %vm1558_vm5, %v1553_v37, %v1557_v43 }
 0x48d   : > { %1565 = vst.msk [vmem:[%s255_s22] sm:$0x3] %vm1563_vm6, %v1559_v13 }
 0x48e   : > { %2050 = shalt.err (!%p2047_p0)
}
 0x48f   : > { %1702 = dma.vmem_to_hbm [thread:$0]  (%p2226_p11), %s1580_s0, 32, %s1582_s12, %s1567_s19  }
 0x490 PF: > { %s1593_s29 = sand.u32 1, %s2081_s15   ;;  %p3193_p1 = scmp.ge.s32.totalorder %s2093_s18, 2 }
 0x491   : > { %s1594_s11 = scalar_lea.sflag [#allocation5], %s1593_s29 }
 0x492   : > { %p1712_p4 = pnand %p3193_p1, %p2230_p12 }
 0x494   : > { %p1713_p7 = pneg %p1712_p4 }
 0x496   : > { %2076 = dma.done.wait (%p1713_p7), %s1594_s11, 32  }
 0x497   : > { %2078 = vsyncadd (%p1713_p7), %s1594_s11, 4294967264  ;;  %p20_p5 = scmp.ge.s32.totalorder %s2201_s21, 4   ;;  %s3194_s15 = smov %s2085_s16 }
 0x498   : > { %s3195_s16 = smov %s2089_s17  ;;  %s3196_s17 = smov %s2213_s24 }
 0x499   : > { %s3197_s18 = smov %s2201_s21  ;;  %22 = sbr.rel (!%p20_p5) target bundleno = 9 (0x9), region = 94 }
 0x49e   :  { %1600 = vsyncpa [#allocation4], 1 }
 0x49f   :  { %1602 = vsyncpa [#allocation4 + $0x1], 1 }
 0x4a0   :  { %1603 = vsyncpa [#allocation7], 1 }
 0x4a1   :  { %1605 = vsyncpa [#allocation7 + $0x1], 1 }
 0x4a2   :  { %1606 = vsyncpa [#allocation5], 1 }
 0x4a3   :  { %1608 = vsyncpa [#allocation5 + $0x1], 1 }

</bundles_post_ra>
